<compile_context>
chip_gen: v6e
topology: v6e:2x2x1
jax: 0.10.0
libtpu: 0.0.40
codegen_flags: <defaults>
</compile_context>

<pallas_src>
import functools

import jax
import jax.numpy as jnp
from jax.experimental import pallas as pl
from jax.experimental.pallas import tpu as pltpu  # noqa: F401  (kept for scratch use at larger shapes)

SKIP = 12  # out = out[12:]


# ----------------------------------------------------------------------------
# Fused Pallas kernel: wavefronted RNN layers + out[12:] + Linear, one call
# ----------------------------------------------------------------------------

def _fused_rnn_kernel(*refs, seq_len, batch_pad, skip, num_layers):
    """Fused tanh-RNN (wavefront over layers) + slice + linear kernel.

    refs (positional, in order):
      x_ref        : (S*Bp, Din)        flattened, batch-padded input
      w0ih_t_ref   : (Din, H)           layer-0 W_ih pre-transposed
      w0hh_t_ref   : (H, H)             layer-0 W_hh pre-transposed
      b_ref        : (L, H)             per-layer b_ih + b_hh, pre-summed
      wcat_l_ref   : (2H, H)  x (L-1)   [W_ih_l^T ; W_hh_l^T] for layers l>=1
      fcw_t_ref    : (H, out_dim)       fc weight pre-transposed
      fcb_ref      : (1, out_dim)
      out_ref      : (S-skip, Bp, out_dim)
    """
    S, Bp, L = seq_len, batch_pad, num_layers

    x_ref = refs[0]
    w0ih_t_ref = refs[1]
    w0hh_t_ref = refs[2]
    b_ref = refs[3]
    wcat_refs = refs[4:4 + (L - 1)]
    fcw_t_ref = refs[4 + (L - 1)]
    fcb_ref = refs[5 + (L - 1)]
    out_ref = refs[6 + (L - 1)]

    H = w0hh_t_ref.shape[0]
    out_dim = fcb_ref.shape[1]

    b_all = b_ref[...]                                    # (L, H)

    # Hoisted layer-0 input-to-hidden matmul over the whole sequence: one MXU
    # pass for all S steps; the recurrence then only does h @ W_hh^T per step.
    pre0 = (jnp.dot(x_ref[...], w0ih_t_ref[...],
                    preferred_element_type=jnp.float32)
            + b_all[0:1, :])                              # (S*Bp, H)

    w0hh_t = w0hh_t_ref[...]                              # (H, H)
    wcats = [r[...] for r in wcat_refs]                   # each (2H, H)
    fcw_t = fcw_t_ref[...]                                # (H, out_dim)

    # Hoist all bias broadcasts out of the unrolled loop.
    b_bcast = [jnp.broadcast_to(b_all[l:l + 1, :], (Bp, H))
               for l in range(1, L)]
    fcb_b = jnp.broadcast_to(fcb_ref[...], (Bp, out_dim))

    # Hidden states live in vregs across the whole recurrence.
    h = [jnp.zeros((Bp, H), jnp.float32) for _ in range(L)]

    # Wavefront: at wall step ws, layer l runs its time step t = ws - l.
    # All layer updates within one wall step read the *old* h values (layer l
    # step t needs layer l-1's step-t output, produced at wall step ws-1),
    # so they are mutually independent and their MXU pushes pipeline.
    for ws in range(S + L - 1):                           # static unroll
        new_h = list(h)
        for l in range(L):
            t = ws - l
            if 0 <= t < S:
                if l == 0:
                    z = (pre0[t * Bp:(t + 1) * Bp, :]     # sublane-aligned slice
                         + jnp.dot(h[0], w0hh_t,
                                   preferred_element_type=jnp.float32))
                else:
                    # Fused input+recurrent matmul: (Bp, 2H) @ (2H, H),
                    # contraction 2H <= 128 -> single MXU pass.
                    cat = jnp.concatenate([h[l - 1], h[l]], axis=-1)
                    z = (jnp.dot(cat, wcats[l - 1],
                                 preferred_element_type=jnp.float32)
                         + b_bcast[l - 1])
                hl = jnp.tanh(z)
                new_h[l] = hl
                if l == L - 1 and t >= skip:
                    # Fused final Linear: independent push, written straight
                    # to the output as soon as the last layer's h_t is ready.
                    out_ref[t - skip] = (
                        jnp.dot(hl, fcw_t,
                                preferred_element_type=jnp.float32)
                        + fcb_b).astype(out_ref.dtype)
        h = new_h


# ----------------------------------------------------------------------------
# Parameter packing (one-time, OUTSIDE the per-call hot path)
# ----------------------------------------------------------------------------

def prepare_params(rnn_params, fc_w, fc_b):
    """Pre-transpose / pre-sum / pack all params once (no per-forward HLOs)."""
    (w_ih0, _, w_hh0, _) = rnn_params[0]
    w0ih_t = jnp.transpose(w_ih0)                         # (Din, H)
    w0hh_t = jnp.transpose(w_hh0)                         # (H, H)
    b_all = jnp.stack([b_ih + b_hh                        # (L, H)
                       for (_, b_ih, _, b_hh) in rnn_params])
    wcats = tuple(
        jnp.concatenate([jnp.transpose(w_ih), jnp.transpose(w_hh)], axis=0)
        for (w_ih, _, w_hh, _) in rnn_params[1:])         # each (2H, H)
    fcw_t = jnp.transpose(fc_w)                           # (H, out_dim)
    fcb2 = fc_b.reshape(1, -1)                            # (1, out_dim)
    return (w0ih_t, w0hh_t, b_all, wcats, fcw_t, fcb2)


# ----------------------------------------------------------------------------
# Wrapper
# ----------------------------------------------------------------------------

@jax.jit
def rnn_model_forward(x, packed):
    """Full forward pass of rnnModel via one fused Pallas kernel.

    x: (S, B, in_dim) float32.  Returns (S-12, B, out_dim) float32.
    """
    w0ih_t, w0hh_t, b_all, wcats, fcw_t, fcb2 = packed
    S, B, Din = x.shape
    H = w0hh_t.shape[0]
    out_dim = fcw_t.shape[1]
    L = b_all.shape[0]
    skip = SKIP

    # Pad batch to a multiple of 8 so every per-step slice / store is
    # sublane-aligned.  Padded rows are independent garbage, dropped below.
    Bp = ((B + 7) // 8) * 8
    xp = x if Bp == B else jnp.pad(x, ((0, 0), (0, Bp - B), (0, 0)))
    x_flat = xp.reshape(S * Bp, Din)

    kernel = functools.partial(
        _fused_rnn_kernel,
        seq_len=S, batch_pad=Bp, skip=skip, num_layers=int(L))

    out = pl.pallas_call(
        kernel,
        out_shape=jax.ShapeDtypeStruct((S - skip, Bp, out_dim), jnp.float32),
    )(x_flat, w0ih_t, w0hh_t, b_all, *wcats, fcw_t, fcb2)

    return out[:, :B, :]


# ----------------------------------------------------------------------------
# Deterministic parameter init (mirrors module __init__ shapes)
# ----------------------------------------------------------------------------

def orthogonal_init(key, shape, gain):
    """nn.init.orthogonal_-style init (QR of a Gaussian), scaled by gain."""
    rows, cols = shape
    a = jax.random.normal(key, (max(rows, cols), min(rows, cols)), jnp.float32)
    q, r = jnp.linalg.qr(a)
    d = jnp.diagonal(r)
    q = q * jnp.where(d >= 0, 1.0, -1.0)[None, :]
    if rows < cols:
        q = q.T
    return (gain * q[:rows, :cols]).astype(jnp.float32)


def init_params(key, in_dim, hidden_dim, out_dim, layer_num):
    optim_range = float(jnp.sqrt(1.0 / hidden_dim))
    rnn_params = []
    for layer in range(layer_num):
        d_in = in_dim if layer == 0 else hidden_dim
        key, k1, k2, k3, k4 = jax.random.split(key, 5)
        w_ih = orthogonal_init(k1, (hidden_dim, d_in), optim_range)
        w_hh = orthogonal_init(k2, (hidden_dim, hidden_dim), optim_range)
        b_ih = jax.random.uniform(k3, (hidden_dim,), jnp.float32,
                                  -optim_range, optim_range)
        b_hh = jax.random.uniform(k4, (hidden_dim,), jnp.float32,
                                  -optim_range, optim_range)
        rnn_params.append((w_ih, b_ih, w_hh, b_hh))
    key, k5, k6 = jax.random.split(key, 3)
    fc_bound = float(jnp.sqrt(1.0 / hidden_dim))
    fc_w = jax.random.uniform(k5, (out_dim, hidden_dim), jnp.float32,
                              -fc_bound, fc_bound)
    fc_b = jax.random.uniform(k6, (out_dim,), jnp.float32, -fc_bound, fc_bound)
    return rnn_params, fc_w, fc_b


# ----------------------------------------------------------------------------
# Pure-JAX reference (for correctness check)
# ----------------------------------------------------------------------------

def rnn_model_ref(x, rnn_params, fc_w, fc_b):
    layer_in = x
    B = x.shape[1]
    H = rnn_params[0][0].shape[0]
    for (w_ih, b_ih, w_hh, b_hh) in rnn_params:
        def step(h, xt):
            h_new = jnp.tanh(xt @ w_ih.T + b_ih + h @ w_hh.T + b_hh)
            return h_new, h_new
        _, outs = jax.lax.scan(step, jnp.zeros((B, H), jnp.float32), layer_in)
        layer_in = outs
    out = layer_in[SKIP:]
    return out @ fc_w.T + fc_b


# ----------------------------------------------------------------------------
# Main
# ----------------------------------------------------------------------------

if __name__ == "__main__":
    # Small shapes consistent with the forward (seq_len must exceed 12).
    in_dim, hidden_dim, out_dim, layer_num = 8, 32, 4, 2
    seq_len, batch = 16, 4

    key = jax.random.PRNGKey(0)
    key, kx, kp = jax.random.split(key, 3)

    x = jax.random.normal(kx, (seq_len, batch, in_dim), jnp.float32)
    rnn_params, fc_w, fc_b = init_params(kp, in_dim, hidden_dim, out_dim,
                                         layer_num)

    packed = prepare_params(rnn_params, fc_w, fc_b)   # one-time packing

    out = rnn_model_forward(x, packed)
    out = jax.block_until_ready(out)

    ref = rnn_model_ref(x, rnn_params, fc_w, fc_b)
    assert out.shape == (seq_len - SKIP, batch, out_dim), out.shape
    assert jnp.allclose(out, ref, atol=2e-5, rtol=2e-5), "mismatch vs reference"

    print("KERNEL_OK")
</pallas_src>

<mosaic_0001>
module attributes {stable_mosaic.version = 11 : i64} {
  func.func @_fused_rnn_kernel(%arg0: memref<128x8xf32, #tpu.memory_space<vmem>>, %arg1: memref<8x32xf32, #tpu.memory_space<vmem>>, %arg2: memref<32x32xf32, #tpu.memory_space<vmem>>, %arg3: memref<2x32xf32, #tpu.memory_space<vmem>>, %arg4: memref<64x32xf32, #tpu.memory_space<vmem>>, %arg5: memref<32x4xf32, #tpu.memory_space<vmem>>, %arg6: memref<1x4xf32, #tpu.memory_space<vmem>>, %arg7: memref<4x8x4xf32, #tpu.memory_space<vmem>>) attributes {dimension_semantics = [], scalar_prefetch = 0 : i64, scratch_operands = 0 : i64, tpu.core_type = #tpu.core_type<tc>} {
    %c0 = arith.constant 0 : index
    %c0_0 = arith.constant 0 : index
    %0 = vector.load %arg3[%c0, %c0_0] : memref<2x32xf32, #tpu.memory_space<vmem>>, vector<2x32xf32>
    %c0_1 = arith.constant 0 : index
    %c0_2 = arith.constant 0 : index
    %1 = vector.load %arg0[%c0_1, %c0_2] : memref<128x8xf32, #tpu.memory_space<vmem>>, vector<128x8xf32>
    %c0_3 = arith.constant 0 : index
    %c0_4 = arith.constant 0 : index
    %2 = vector.load %arg1[%c0_3, %c0_4] : memref<8x32xf32, #tpu.memory_space<vmem>>, vector<8x32xf32>
    %cst = arith.constant dense<0.000000e+00> : vector<128x32xf32>
    %3 = tpu.matmul %1, %2, %cst {dimension_numbers = #tpu.dot_dimension_numbers<[1], [0], [0], [1], [0, 0, 1, 1], [], []>} : vector<128x8xf32>, vector<8x32xf32>, vector<128x32xf32> -> vector<128x32xf32>
    %4 = vector.extract_strided_slice %0 {offsets = [0, 0], sizes = [1, 32], strides = [1, 1]} : vector<2x32xf32> to vector<1x32xf32>
    %5 = vector.broadcast %4 : vector<1x32xf32> to vector<128x32xf32>
    %6 = arith.addf %3, %5 : vector<128x32xf32>
    %c0_5 = arith.constant 0 : index
    %c0_6 = arith.constant 0 : index
    %7 = vector.load %arg2[%c0_5, %c0_6] : memref<32x32xf32, #tpu.memory_space<vmem>>, vector<32x32xf32>
    %c0_7 = arith.constant 0 : index
    %c0_8 = arith.constant 0 : index
    %8 = vector.load %arg4[%c0_7, %c0_8] : memref<64x32xf32, #tpu.memory_space<vmem>>, vector<64x32xf32>
    %c0_9 = arith.constant 0 : index
    %c0_10 = arith.constant 0 : index
    %9 = vector.load %arg5[%c0_9, %c0_10] : memref<32x4xf32, #tpu.memory_space<vmem>>, vector<32x4xf32>
    %10 = vector.extract_strided_slice %0 {offsets = [1, 0], sizes = [1, 32], strides = [1, 1]} : vector<2x32xf32> to vector<1x32xf32>
    %11 = vector.shape_cast %10 : vector<1x32xf32> to vector<1x32xf32>
    %12 = vector.broadcast %11 : vector<1x32xf32> to vector<8x32xf32>
    %c0_11 = arith.constant 0 : index
    %c0_12 = arith.constant 0 : index
    %13 = vector.load %arg6[%c0_11, %c0_12] : memref<1x4xf32, #tpu.memory_space<vmem>>, vector<1x4xf32>
    %14 = vector.shape_cast %13 : vector<1x4xf32> to vector<1x4xf32>
    %15 = vector.broadcast %14 : vector<1x4xf32> to vector<8x4xf32>
    %cst_13 = arith.constant 0.000000e+00 : f32
    %16 = vector.broadcast %cst_13 : f32 to vector<8x32xf32>
    %cst_14 = arith.constant 0.000000e+00 : f32
    %17 = vector.broadcast %cst_14 : f32 to vector<8x32xf32>
    %18 = vector.extract_strided_slice %6 {offsets = [0, 0], sizes = [8, 32], strides = [1, 1]} : vector<128x32xf32> to vector<8x32xf32>
    %cst_15 = arith.constant dense<0.000000e+00> : vector<8x32xf32>
    %19 = tpu.matmul %16, %7, %cst_15 {dimension_numbers = #tpu.dot_dimension_numbers<[1], [0], [0], [1], [0, 0, 1, 1], [], []>} : vector<8x32xf32>, vector<32x32xf32>, vector<8x32xf32> -> vector<8x32xf32>
    %20 = arith.addf %18, %19 : vector<8x32xf32>
    %21 = math.tanh %20 : vector<8x32xf32>
    %22 = vector.extract_strided_slice %6 {offsets = [8, 0], sizes = [8, 32], strides = [1, 1]} : vector<128x32xf32> to vector<8x32xf32>
    %cst_16 = arith.constant dense<0.000000e+00> : vector<8x32xf32>
    %23 = tpu.matmul %21, %7, %cst_16 {dimension_numbers = #tpu.dot_dimension_numbers<[1], [0], [0], [1], [0, 0, 1, 1], [], []>} : vector<8x32xf32>, vector<32x32xf32>, vector<8x32xf32> -> vector<8x32xf32>
    %24 = arith.addf %22, %23 : vector<8x32xf32>
    %25 = math.tanh %24 : vector<8x32xf32>
    %26 = tpu.concatenate %21, %17 in 1 : vector<8x32xf32>, vector<8x32xf32> -> vector<8x64xf32>
    %cst_17 = arith.constant dense<0.000000e+00> : vector<8x32xf32>
    %27 = tpu.matmul %26, %8, %cst_17 {dimension_numbers = #tpu.dot_dimension_numbers<[1], [0], [0], [1], [0, 0, 1, 1], [], []>} : vector<8x64xf32>, vector<64x32xf32>, vector<8x32xf32> -> vector<8x32xf32>
    %28 = arith.addf %27, %12 : vector<8x32xf32>
    %29 = math.tanh %28 : vector<8x32xf32>
    %30 = vector.extract_strided_slice %6 {offsets = [16, 0], sizes = [8, 32], strides = [1, 1]} : vector<128x32xf32> to vector<8x32xf32>
    %cst_18 = arith.constant dense<0.000000e+00> : vector<8x32xf32>
    %31 = tpu.matmul %25, %7, %cst_18 {dimension_numbers = #tpu.dot_dimension_numbers<[1], [0], [0], [1], [0, 0, 1, 1], [], []>} : vector<8x32xf32>, vector<32x32xf32>, vector<8x32xf32> -> vector<8x32xf32>
    %32 = arith.addf %30, %31 : vector<8x32xf32>
    %33 = math.tanh %32 : vector<8x32xf32>
    %34 = tpu.concatenate %25, %29 in 1 : vector<8x32xf32>, vector<8x32xf32> -> vector<8x64xf32>
    %cst_19 = arith.constant dense<0.000000e+00> : vector<8x32xf32>
    %35 = tpu.matmul %34, %8, %cst_19 {dimension_numbers = #tpu.dot_dimension_numbers<[1], [0], [0], [1], [0, 0, 1, 1], [], []>} : vector<8x64xf32>, vector<64x32xf32>, vector<8x32xf32> -> vector<8x32xf32>
    %36 = arith.addf %35, %12 : vector<8x32xf32>
    %37 = math.tanh %36 : vector<8x32xf32>
    %38 = vector.extract_strided_slice %6 {offsets = [24, 0], sizes = [8, 32], strides = [1, 1]} : vector<128x32xf32> to vector<8x32xf32>
    %cst_20 = arith.constant dense<0.000000e+00> : vector<8x32xf32>
    %39 = tpu.matmul %33, %7, %cst_20 {dimension_numbers = #tpu.dot_dimension_numbers<[1], [0], [0], [1], [0, 0, 1, 1], [], []>} : vector<8x32xf32>, vector<32x32xf32>, vector<8x32xf32> -> vector<8x32xf32>
    %40 = arith.addf %38, %39 : vector<8x32xf32>
    %41 = math.tanh %40 : vector<8x32xf32>
    %42 = tpu.concatenate %33, %37 in 1 : vector<8x32xf32>, vector<8x32xf32> -> vector<8x64xf32>
    %cst_21 = arith.constant dense<0.000000e+00> : vector<8x32xf32>
    %43 = tpu.matmul %42, %8, %cst_21 {dimension_numbers = #tpu.dot_dimension_numbers<[1], [0], [0], [1], [0, 0, 1, 1], [], []>} : vector<8x64xf32>, vector<64x32xf32>, vector<8x32xf32> -> vector<8x32xf32>
    %44 = arith.addf %43, %12 : vector<8x32xf32>
    %45 = math.tanh %44 : vector<8x32xf32>
    %46 = vector.extract_strided_slice %6 {offsets = [32, 0], sizes = [8, 32], strides = [1, 1]} : vector<128x32xf32> to vector<8x32xf32>
    %cst_22 = arith.constant dense<0.000000e+00> : vector<8x32xf32>
    %47 = tpu.matmul %41, %7, %cst_22 {dimension_numbers = #tpu.dot_dimension_numbers<[1], [0], [0], [1], [0, 0, 1, 1], [], []>} : vector<8x32xf32>, vector<32x32xf32>, vector<8x32xf32> -> vector<8x32xf32>
    %48 = arith.addf %46, %47 : vector<8x32xf32>
    %49 = math.tanh %48 : vector<8x32xf32>
    %50 = tpu.concatenate %41, %45 in 1 : vector<8x32xf32>, vector<8x32xf32> -> vector<8x64xf32>
    %cst_23 = arith.constant dense<0.000000e+00> : vector<8x32xf32>
    %51 = tpu.matmul %50, %8, %cst_23 {dimension_numbers = #tpu.dot_dimension_numbers<[1], [0], [0], [1], [0, 0, 1, 1], [], []>} : vector<8x64xf32>, vector<64x32xf32>, vector<8x32xf32> -> vector<8x32xf32>
    %52 = arith.addf %51, %12 : vector<8x32xf32>
    %53 = math.tanh %52 : vector<8x32xf32>
    %54 = vector.extract_strided_slice %6 {offsets = [40, 0], sizes = [8, 32], strides = [1, 1]} : vector<128x32xf32> to vector<8x32xf32>
    %cst_24 = arith.constant dense<0.000000e+00> : vector<8x32xf32>
    %55 = tpu.matmul %49, %7, %cst_24 {dimension_numbers = #tpu.dot_dimension_numbers<[1], [0], [0], [1], [0, 0, 1, 1], [], []>} : vector<8x32xf32>, vector<32x32xf32>, vector<8x32xf32> -> vector<8x32xf32>
    %56 = arith.addf %54, %55 : vector<8x32xf32>
    %57 = math.tanh %56 : vector<8x32xf32>
    %58 = tpu.concatenate %49, %53 in 1 : vector<8x32xf32>, vector<8x32xf32> -> vector<8x64xf32>
    %cst_25 = arith.constant dense<0.000000e+00> : vector<8x32xf32>
    %59 = tpu.matmul %58, %8, %cst_25 {dimension_numbers = #tpu.dot_dimension_numbers<[1], [0], [0], [1], [0, 0, 1, 1], [], []>} : vector<8x64xf32>, vector<64x32xf32>, vector<8x32xf32> -> vector<8x32xf32>
    %60 = arith.addf %59, %12 : vector<8x32xf32>
    %61 = math.tanh %60 : vector<8x32xf32>
    %62 = vector.extract_strided_slice %6 {offsets = [48, 0], sizes = [8, 32], strides = [1, 1]} : vector<128x32xf32> to vector<8x32xf32>
    %cst_26 = arith.constant dense<0.000000e+00> : vector<8x32xf32>
    %63 = tpu.matmul %57, %7, %cst_26 {dimension_numbers = #tpu.dot_dimension_numbers<[1], [0], [0], [1], [0, 0, 1, 1], [], []>} : vector<8x32xf32>, vector<32x32xf32>, vector<8x32xf32> -> vector<8x32xf32>
    %64 = arith.addf %62, %63 : vector<8x32xf32>
    %65 = math.tanh %64 : vector<8x32xf32>
    %66 = tpu.concatenate %57, %61 in 1 : vector<8x32xf32>, vector<8x32xf32> -> vector<8x64xf32>
    %cst_27 = arith.constant dense<0.000000e+00> : vector<8x32xf32>
    %67 = tpu.matmul %66, %8, %cst_27 {dimension_numbers = #tpu.dot_dimension_numbers<[1], [0], [0], [1], [0, 0, 1, 1], [], []>} : vector<8x64xf32>, vector<64x32xf32>, vector<8x32xf32> -> vector<8x32xf32>
    %68 = arith.addf %67, %12 : vector<8x32xf32>
    %69 = math.tanh %68 : vector<8x32xf32>
    %70 = vector.extract_strided_slice %6 {offsets = [56, 0], sizes = [8, 32], strides = [1, 1]} : vector<128x32xf32> to vector<8x32xf32>
    %cst_28 = arith.constant dense<0.000000e+00> : vector<8x32xf32>
    %71 = tpu.matmul %65, %7, %cst_28 {dimension_numbers = #tpu.dot_dimension_numbers<[1], [0], [0], [1], [0, 0, 1, 1], [], []>} : vector<8x32xf32>, vector<32x32xf32>, vector<8x32xf32> -> vector<8x32xf32>
    %72 = arith.addf %70, %71 : vector<8x32xf32>
    %73 = math.tanh %72 : vector<8x32xf32>
    %74 = tpu.concatenate %65, %69 in 1 : vector<8x32xf32>, vector<8x32xf32> -> vector<8x64xf32>
    %cst_29 = arith.constant dense<0.000000e+00> : vector<8x32xf32>
    %75 = tpu.matmul %74, %8, %cst_29 {dimension_numbers = #tpu.dot_dimension_numbers<[1], [0], [0], [1], [0, 0, 1, 1], [], []>} : vector<8x64xf32>, vector<64x32xf32>, vector<8x32xf32> -> vector<8x32xf32>
    %76 = arith.addf %75, %12 : vector<8x32xf32>
    %77 = math.tanh %76 : vector<8x32xf32>
    %78 = vector.extract_strided_slice %6 {offsets = [64, 0], sizes = [8, 32], strides = [1, 1]} : vector<128x32xf32> to vector<8x32xf32>
    %cst_30 = arith.constant dense<0.000000e+00> : vector<8x32xf32>
    %79 = tpu.matmul %73, %7, %cst_30 {dimension_numbers = #tpu.dot_dimension_numbers<[1], [0], [0], [1], [0, 0, 1, 1], [], []>} : vector<8x32xf32>, vector<32x32xf32>, vector<8x32xf32> -> vector<8x32xf32>
    %80 = arith.addf %78, %79 : vector<8x32xf32>
    %81 = math.tanh %80 : vector<8x32xf32>
    %82 = tpu.concatenate %73, %77 in 1 : vector<8x32xf32>, vector<8x32xf32> -> vector<8x64xf32>
    %cst_31 = arith.constant dense<0.000000e+00> : vector<8x32xf32>
    %83 = tpu.matmul %82, %8, %cst_31 {dimension_numbers = #tpu.dot_dimension_numbers<[1], [0], [0], [1], [0, 0, 1, 1], [], []>} : vector<8x64xf32>, vector<64x32xf32>, vector<8x32xf32> -> vector<8x32xf32>
    %84 = arith.addf %83, %12 : vector<8x32xf32>
    %85 = math.tanh %84 : vector<8x32xf32>
    %86 = vector.extract_strided_slice %6 {offsets = [72, 0], sizes = [8, 32], strides = [1, 1]} : vector<128x32xf32> to vector<8x32xf32>
    %cst_32 = arith.constant dense<0.000000e+00> : vector<8x32xf32>
    %87 = tpu.matmul %81, %7, %cst_32 {dimension_numbers = #tpu.dot_dimension_numbers<[1], [0], [0], [1], [0, 0, 1, 1], [], []>} : vector<8x32xf32>, vector<32x32xf32>, vector<8x32xf32> -> vector<8x32xf32>
    %88 = arith.addf %86, %87 : vector<8x32xf32>
    %89 = math.tanh %88 : vector<8x32xf32>
    %90 = tpu.concatenate %81, %85 in 1 : vector<8x32xf32>, vector<8x32xf32> -> vector<8x64xf32>
    %cst_33 = arith.constant dense<0.000000e+00> : vector<8x32xf32>
    %91 = tpu.matmul %90, %8, %cst_33 {dimension_numbers = #tpu.dot_dimension_numbers<[1], [0], [0], [1], [0, 0, 1, 1], [], []>} : vector<8x64xf32>, vector<64x32xf32>, vector<8x32xf32> -> vector<8x32xf32>
    %92 = arith.addf %91, %12 : vector<8x32xf32>
    %93 = math.tanh %92 : vector<8x32xf32>
    %94 = vector.extract_strided_slice %6 {offsets = [80, 0], sizes = [8, 32], strides = [1, 1]} : vector<128x32xf32> to vector<8x32xf32>
    %cst_34 = arith.constant dense<0.000000e+00> : vector<8x32xf32>
    %95 = tpu.matmul %89, %7, %cst_34 {dimension_numbers = #tpu.dot_dimension_numbers<[1], [0], [0], [1], [0, 0, 1, 1], [], []>} : vector<8x32xf32>, vector<32x32xf32>, vector<8x32xf32> -> vector<8x32xf32>
    %96 = arith.addf %94, %95 : vector<8x32xf32>
    %97 = math.tanh %96 : vector<8x32xf32>
    %98 = tpu.concatenate %89, %93 in 1 : vector<8x32xf32>, vector<8x32xf32> -> vector<8x64xf32>
    %cst_35 = arith.constant dense<0.000000e+00> : vector<8x32xf32>
    %99 = tpu.matmul %98, %8, %cst_35 {dimension_numbers = #tpu.dot_dimension_numbers<[1], [0], [0], [1], [0, 0, 1, 1], [], []>} : vector<8x64xf32>, vector<64x32xf32>, vector<8x32xf32> -> vector<8x32xf32>
    %100 = arith.addf %99, %12 : vector<8x32xf32>
    %101 = math.tanh %100 : vector<8x32xf32>
    %102 = vector.extract_strided_slice %6 {offsets = [88, 0], sizes = [8, 32], strides = [1, 1]} : vector<128x32xf32> to vector<8x32xf32>
    %cst_36 = arith.constant dense<0.000000e+00> : vector<8x32xf32>
    %103 = tpu.matmul %97, %7, %cst_36 {dimension_numbers = #tpu.dot_dimension_numbers<[1], [0], [0], [1], [0, 0, 1, 1], [], []>} : vector<8x32xf32>, vector<32x32xf32>, vector<8x32xf32> -> vector<8x32xf32>
    %104 = arith.addf %102, %103 : vector<8x32xf32>
    %105 = math.tanh %104 : vector<8x32xf32>
    %106 = tpu.concatenate %97, %101 in 1 : vector<8x32xf32>, vector<8x32xf32> -> vector<8x64xf32>
    %cst_37 = arith.constant dense<0.000000e+00> : vector<8x32xf32>
    %107 = tpu.matmul %106, %8, %cst_37 {dimension_numbers = #tpu.dot_dimension_numbers<[1], [0], [0], [1], [0, 0, 1, 1], [], []>} : vector<8x64xf32>, vector<64x32xf32>, vector<8x32xf32> -> vector<8x32xf32>
    %108 = arith.addf %107, %12 : vector<8x32xf32>
    %109 = math.tanh %108 : vector<8x32xf32>
    %110 = vector.extract_strided_slice %6 {offsets = [96, 0], sizes = [8, 32], strides = [1, 1]} : vector<128x32xf32> to vector<8x32xf32>
    %cst_38 = arith.constant dense<0.000000e+00> : vector<8x32xf32>
    %111 = tpu.matmul %105, %7, %cst_38 {dimension_numbers = #tpu.dot_dimension_numbers<[1], [0], [0], [1], [0, 0, 1, 1], [], []>} : vector<8x32xf32>, vector<32x32xf32>, vector<8x32xf32> -> vector<8x32xf32>
    %112 = arith.addf %110, %111 : vector<8x32xf32>
    %113 = math.tanh %112 : vector<8x32xf32>
    %114 = tpu.concatenate %105, %109 in 1 : vector<8x32xf32>, vector<8x32xf32> -> vector<8x64xf32>
    %cst_39 = arith.constant dense<0.000000e+00> : vector<8x32xf32>
    %115 = tpu.matmul %114, %8, %cst_39 {dimension_numbers = #tpu.dot_dimension_numbers<[1], [0], [0], [1], [0, 0, 1, 1], [], []>} : vector<8x64xf32>, vector<64x32xf32>, vector<8x32xf32> -> vector<8x32xf32>
    %116 = arith.addf %115, %12 : vector<8x32xf32>
    %117 = math.tanh %116 : vector<8x32xf32>
    %118 = vector.extract_strided_slice %6 {offsets = [104, 0], sizes = [8, 32], strides = [1, 1]} : vector<128x32xf32> to vector<8x32xf32>
    %cst_40 = arith.constant dense<0.000000e+00> : vector<8x32xf32>
    %119 = tpu.matmul %113, %7, %cst_40 {dimension_numbers = #tpu.dot_dimension_numbers<[1], [0], [0], [1], [0, 0, 1, 1], [], []>} : vector<8x32xf32>, vector<32x32xf32>, vector<8x32xf32> -> vector<8x32xf32>
    %120 = arith.addf %118, %119 : vector<8x32xf32>
    %121 = math.tanh %120 : vector<8x32xf32>
    %122 = tpu.concatenate %113, %117 in 1 : vector<8x32xf32>, vector<8x32xf32> -> vector<8x64xf32>
    %cst_41 = arith.constant dense<0.000000e+00> : vector<8x32xf32>
    %123 = tpu.matmul %122, %8, %cst_41 {dimension_numbers = #tpu.dot_dimension_numbers<[1], [0], [0], [1], [0, 0, 1, 1], [], []>} : vector<8x64xf32>, vector<64x32xf32>, vector<8x32xf32> -> vector<8x32xf32>
    %124 = arith.addf %123, %12 : vector<8x32xf32>
    %125 = math.tanh %124 : vector<8x32xf32>
    %cst_42 = arith.constant dense<0.000000e+00> : vector<8x4xf32>
    %126 = tpu.matmul %125, %9, %cst_42 {dimension_numbers = #tpu.dot_dimension_numbers<[1], [0], [0], [1], [0, 0, 1, 1], [], []>} : vector<8x32xf32>, vector<32x4xf32>, vector<8x4xf32> -> vector<8x4xf32>
    %127 = arith.addf %126, %15 : vector<8x4xf32>
    %c0_43 = arith.constant 0 : index
    %c0_44 = arith.constant 0 : index
    %c0_45 = arith.constant 0 : index
    %128 = vector.load %arg7[%c0_43, %c0_44, %c0_45] : memref<4x8x4xf32, #tpu.memory_space<vmem>>, vector<1x8x4xf32>
    %129 = vector.shape_cast %128 : vector<1x8x4xf32> to vector<8x4xf32>
    %130 = vector.shape_cast %127 : vector<8x4xf32> to vector<1x8x4xf32>
    tpu.vector_store %arg7[%c0_43, %c0_44, %c0_45], %130 {strides = array<i32>} : memref<4x8x4xf32, #tpu.memory_space<vmem>>, vector<1x8x4xf32>,
    %131 = vector.extract_strided_slice %6 {offsets = [112, 0], sizes = [8, 32], strides = [1, 1]} : vector<128x32xf32> to vector<8x32xf32>
    %cst_46 = arith.constant dense<0.000000e+00> : vector<8x32xf32>
    %132 = tpu.matmul %121, %7, %cst_46 {dimension_numbers = #tpu.dot_dimension_numbers<[1], [0], [0], [1], [0, 0, 1, 1], [], []>} : vector<8x32xf32>, vector<32x32xf32>, vector<8x32xf32> -> vector<8x32xf32>
    %133 = arith.addf %131, %132 : vector<8x32xf32>
    %134 = math.tanh %133 : vector<8x32xf32>
    %135 = tpu.concatenate %121, %125 in 1 : vector<8x32xf32>, vector<8x32xf32> -> vector<8x64xf32>
    %cst_47 = arith.constant dense<0.000000e+00> : vector<8x32xf32>
    %136 = tpu.matmul %135, %8, %cst_47 {dimension_numbers = #tpu.dot_dimension_numbers<[1], [0], [0], [1], [0, 0, 1, 1], [], []>} : vector<8x64xf32>, vector<64x32xf32>, vector<8x32xf32> -> vector<8x32xf32>
    %137 = arith.addf %136, %12 : vector<8x32xf32>
    %138 = math.tanh %137 : vector<8x32xf32>
    %cst_48 = arith.constant dense<0.000000e+00> : vector<8x4xf32>
    %139 = tpu.matmul %138, %9, %cst_48 {dimension_numbers = #tpu.dot_dimension_numbers<[1], [0], [0], [1], [0, 0, 1, 1], [], []>} : vector<8x32xf32>, vector<32x4xf32>, vector<8x4xf32> -> vector<8x4xf32>
    %140 = arith.addf %139, %15 : vector<8x4xf32>
    %c1 = arith.constant 1 : index
    %c0_49 = arith.constant 0 : index
    %c0_50 = arith.constant 0 : index
    %141 = vector.load %arg7[%c1, %c0_49, %c0_50] : memref<4x8x4xf32, #tpu.memory_space<vmem>>, vector<1x8x4xf32>
    %142 = vector.shape_cast %141 : vector<1x8x4xf32> to vector<8x4xf32>
    %143 = vector.shape_cast %140 : vector<8x4xf32> to vector<1x8x4xf32>
    tpu.vector_store %arg7[%c1, %c0_49, %c0_50], %143 {strides = array<i32>} : memref<4x8x4xf32, #tpu.memory_space<vmem>>, vector<1x8x4xf32>,
    %144 = vector.extract_strided_slice %6 {offsets = [120, 0], sizes = [8, 32], strides = [1, 1]} : vector<128x32xf32> to vector<8x32xf32>
    %cst_51 = arith.constant dense<0.000000e+00> : vector<8x32xf32>
    %145 = tpu.matmul %134, %7, %cst_51 {dimension_numbers = #tpu.dot_dimension_numbers<[1], [0], [0], [1], [0, 0, 1, 1], [], []>} : vector<8x32xf32>, vector<32x32xf32>, vector<8x32xf32> -> vector<8x32xf32>
    %146 = arith.addf %144, %145 : vector<8x32xf32>
    %147 = math.tanh %146 : vector<8x32xf32>
    %148 = tpu.concatenate %134, %138 in 1 : vector<8x32xf32>, vector<8x32xf32> -> vector<8x64xf32>
    %cst_52 = arith.constant dense<0.000000e+00> : vector<8x32xf32>
    %149 = tpu.matmul %148, %8, %cst_52 {dimension_numbers = #tpu.dot_dimension_numbers<[1], [0], [0], [1], [0, 0, 1, 1], [], []>} : vector<8x64xf32>, vector<64x32xf32>, vector<8x32xf32> -> vector<8x32xf32>
    %150 = arith.addf %149, %12 : vector<8x32xf32>
    %151 = math.tanh %150 : vector<8x32xf32>
    %cst_53 = arith.constant dense<0.000000e+00> : vector<8x4xf32>
    %152 = tpu.matmul %151, %9, %cst_53 {dimension_numbers = #tpu.dot_dimension_numbers<[1], [0], [0], [1], [0, 0, 1, 1], [], []>} : vector<8x32xf32>, vector<32x4xf32>, vector<8x4xf32> -> vector<8x4xf32>
    %153 = arith.addf %152, %15 : vector<8x4xf32>
    %c2 = arith.constant 2 : index
    %c0_54 = arith.constant 0 : index
    %c0_55 = arith.constant 0 : index
    %154 = vector.load %arg7[%c2, %c0_54, %c0_55] : memref<4x8x4xf32, #tpu.memory_space<vmem>>, vector<1x8x4xf32>
    %155 = vector.shape_cast %154 : vector<1x8x4xf32> to vector<8x4xf32>
    %156 = vector.shape_cast %153 : vector<8x4xf32> to vector<1x8x4xf32>
    tpu.vector_store %arg7[%c2, %c0_54, %c0_55], %156 {strides = array<i32>} : memref<4x8x4xf32, #tpu.memory_space<vmem>>, vector<1x8x4xf32>,
    %157 = tpu.concatenate %147, %151 in 1 : vector<8x32xf32>, vector<8x32xf32> -> vector<8x64xf32>
    %cst_56 = arith.constant dense<0.000000e+00> : vector<8x32xf32>
    %158 = tpu.matmul %157, %8, %cst_56 {dimension_numbers = #tpu.dot_dimension_numbers<[1], [0], [0], [1], [0, 0, 1, 1], [], []>} : vector<8x64xf32>, vector<64x32xf32>, vector<8x32xf32> -> vector<8x32xf32>
    %159 = arith.addf %158, %12 : vector<8x32xf32>
    %160 = math.tanh %159 : vector<8x32xf32>
    %cst_57 = arith.constant dense<0.000000e+00> : vector<8x4xf32>
    %161 = tpu.matmul %160, %9, %cst_57 {dimension_numbers = #tpu.dot_dimension_numbers<[1], [0], [0], [1], [0, 0, 1, 1], [], []>} : vector<8x32xf32>, vector<32x4xf32>, vector<8x4xf32> -> vector<8x4xf32>
    %162 = arith.addf %161, %15 : vector<8x4xf32>
    %c3 = arith.constant 3 : index
    %c0_58 = arith.constant 0 : index
    %c0_59 = arith.constant 0 : index
    %163 = vector.load %arg7[%c3, %c0_58, %c0_59] : memref<4x8x4xf32, #tpu.memory_space<vmem>>, vector<1x8x4xf32>
    %164 = vector.shape_cast %163 : vector<1x8x4xf32> to vector<8x4xf32>
    %165 = vector.shape_cast %162 : vector<8x4xf32> to vector<1x8x4xf32>
    tpu.vector_store %arg7[%c3, %c0_58, %c0_59], %165 {strides = array<i32>} : memref<4x8x4xf32, #tpu.memory_space<vmem>>, vector<1x8x4xf32>,
    return
  }
}

</mosaic_0001>

<bundles_post_ra>
// kernel: rnn_model_forward.1
= control target key start
LH: loop header
LB: loop body
LE: loop exit
PB: predicated region body
PF: predicated region fallthrough
CT: control target
= control target key end

     0   :  { %vm48_vm0 = vcmask 64512   ;;  %v3977_v0 = vmov 0.0   ;;  %vm3978_vm1 = vmmov 0   ;;  %v44_v15 = vlaneseq  ;;  %s4929_s1 = inlined_call_operand.vmem [shape: f32[8,32], index: 1, kind: input, shape index: {}]   ;;  %s4930_s2 = inlined_call_operand.vmem [shape: f32[32,32], index: 2, kind: input, shape index: {}]   ;;  %s4931_s0 = inlined_call_operand.vmem [shape: f32[128,8], index: 0, kind: input, shape index: {}]   ;;  %s4932_s3 = inlined_call_operand.vmem [shape: f32[2,32], index: 3, kind: input, shape index: {}]   ;;  %s4933_s4 = inlined_call_operand.vmem [shape: f32[64,32], index: 4, kind: input, shape index: {}]   ;;  %s4934_s5 = inlined_call_operand.vmem [shape: f32[32,4], index: 5, kind: input, shape index: {}]   ;;  %s4935_s6 = inlined_call_operand.vmem [shape: f32[1,4], index: 6, kind: input, shape index: {}]   ;;  %s4936_s7 = inlined_call_operand.vmem [shape: f32[4,8,4], index: 7, kind: output, shape index: {}]  }
   0x1   :  { %3374 = vmatprep.subr.mxu1 %v3977_v0  ;;  %v43_v1 = vld [vmem:[%s4929_s1] sm:$0xff]  ;;  %v4027_v2 = vld [vmem:[%s4930_s2 + $0x18] sm:$0xff]  ;;  %3382 = vmatprep.mubr.msk.f32.mxu1 %vm3978_vm1, %v3977_v0  ;;  %v28_v4 = vld [vmem:[%s4931_s0 + $0x8] sm:$0xff]  ;;  %vm269_vm2 = vcmask 261120   ;;  %vm421_vm3 = vcmask 523264   ;;  %vm2417_vm4 = vcmask 31744  }
   0x2   :  { %v27_v3 = vld [vmem:[%s4931_s0] sm:$0xff]  ;;  %3348 = vmatprep.subr.mxu0 %v43_v1  ;;  %3375 = vmatpush3.msra.mxu1 %v4027_v2  ;;  %v4041_v5 = vld [vmem:[%s4930_s2 + $0x10] sm:$0xff]  ;;  %v4049_v6 = vld [vmem:[%s4930_s2 + $0x8] sm:$0xff]  ;;  %v4110_v16 = vshrl.u32 %v44_v15, 7 }
   0x3   :  { %3349 = vmatpush3.msra.mxu0 %v43_v1  ;;  %3350 = vmatprep.mubr.msk.f32.mxu0 %vm48_vm0, %v27_v3  ;;  %v4057_v7 = vld [vmem:[%s4930_s2] sm:$0xff]  ;;  %v29_v8 = vld [vmem:[%s4931_s0 + $0x10] sm:$0xff]  ;;  %v30_v9 = vld [vmem:[%s4931_s0 + $0x18] sm:$0xff] }
   0x4   :  { %3376 = vmatprep.subr.mxu1 %v3977_v0  ;;  %3351 = vmatmul.mubr.msk.f32.vlgmr.msra.gmra.mxu0 %vm48_vm0, %v28_v4  ;;  %v31_v10 = vld [vmem:[%s4931_s0 + $0x20] sm:$0xff]  ;;  %v32_v11 = vld [vmem:[%s4931_s0 + $0x28] sm:$0xff]  ;;  %v33_v12 = vld [vmem:[%s4931_s0 + $0x30] sm:$0xff]  ;;  %v46_v17 = vsub.s32 0, %v4110_v16  ;;  %v260_v47 = vsub.s32 1, %v4110_v16 }
   0x5   :  { %3377 = vmatpush3.msra.mxu1 %v4041_v5  ;;  %3415 = vmatprep.subr.mxu0 %v3977_v0  ;;  %v34_v13 = vld [vmem:[%s4931_s0 + $0x38] sm:$0xff]  ;;  %v35_v14 = vld [vmem:[%s4931_s0 + $0x40] sm:$0xff]  ;;  %v4133_v28 = vld [vmem:[%s4933_s4 + $0x30] sm:$0xff] }
   0x6   :  { %3378 = vmatprep.subr.mxu1 %v3977_v0  ;;  %3416 = vmatpush3.msra.mxu0 %v4027_v2  ;;  %v4116_v18 = vld [vmem:[%s4932_s3] sm:$0x3]  ;;  %v4127_v26 = vld [vmem:[%s4933_s4 + $0x38] sm:$0xff]  ;;  %v4142_v29 = vld [vmem:[%s4933_s4 + $0x28] sm:$0xff] }
   0x7   :  { %3379 = vmatpush3.msra.mxu1 %v4049_v6  ;;  %3417 = vmatprep.subr.mxu0 %v3977_v0  ;;  %v4119_v19 = vrot.slane %v4116_v18, %v46_v17  ;;  %v4149_v30 = vld [vmem:[%s4933_s4 + $0x20] sm:$0xff]  ;;  %v4156_v31 = vld [vmem:[%s4933_s4 + $0x18] sm:$0xff]  ;;  %v4163_v32 = vld [vmem:[%s4933_s4 + $0x10] sm:$0xff]  ;;  %v4237_v48 = vrot.slane %v4116_v18, %v260_v47 }
   0x8   :  { %3380 = vmatprep.subr.mxu1 %v3977_v0  ;;  %3418 = vmatpush3.msra.mxu0 %v4041_v5  ;;  %v4170_v33 = vld [vmem:[%s4933_s4 + $0x8] sm:$0xff]  ;;  %v4177_v34 = vld [vmem:[%s4933_s4] sm:$0xff]  ;;  %v37_v37 = vld [vmem:[%s4931_s0 + $0x50] sm:$0xff] }
   0x9   :  { %3381 = vmatpush3.msra.mxu1 %v4057_v7  ;;  %3419 = vmatprep.subr.mxu0 %v3977_v0  ;;  %v36_v36 = vld [vmem:[%s4931_s0 + $0x48] sm:$0xff]  ;;  %v38_v38 = vld [vmem:[%s4931_s0 + $0x58] sm:$0xff]  ;;  %v39_v39 = vld [vmem:[%s4931_s0 + $0x60] sm:$0xff] }
   0xa   :  { %3383 = vmatmul.mubr.f32.vlgmr.msra.gmra.mxu1 %v3977_v0  ;;  %3385 = vmatprep.subr.mxu1 %v3977_v0  ;;  %v40_v40 = vld [vmem:[%s4931_s0 + $0x68] sm:$0xff]  ;;  %v41_v41 = vld [vmem:[%s4931_s0 + $0x70] sm:$0xff]  ;;  %v42_v42 = vld [vmem:[%s4931_s0 + $0x78] sm:$0xff]  ;;  %s3979_s0 = smov 32  }
   0xb   :  { %3386 = vmatpush3.msra.mxu1 %v4027_v2  ;;  %3393 = vmatprep.mubr.msk.f32.mxu1 %vm3978_vm1, %v3977_v0 }
   0xc   :  { %3387 = vmatprep.subr.mxu1 %v3977_v0  ;;  %3420 = vmatpush3.msra.mxu0 %v4049_v6 }
   0xd   :  { %3388 = vmatpush3.msra.mxu1 %v4041_v5  ;;  %3421 = vmatprep.subr.mxu0 %v3977_v0 }
   0xe   :  { %3389 = vmatprep.subr.mxu1 %v3977_v0  ;;  %3422 = vmatpush3.msra.mxu0 %v4057_v7 }
   0xf   :  { %3390 = vmatpush3.msra.mxu1 %v4049_v6  ;;  %3445 = vmatprep.subr.mxu0 %v3977_v0 }
  0x10   :  { %3391 = vmatprep.subr.mxu1 %v3977_v0  ;;  %3353 = vmatprep.mubr.msk.f32.mxu0 %vm48_vm0, %v29_v8 }
  0x11   :  { %3392 = vmatpush3.msra.mxu1 %v4057_v7  ;;  %3354 = vmatmul.mubr.msk.f32.gmra.mxu0 %vm48_vm0, %v30_v9 }
  0x12   :  { %3396 = vmatprep.subr.mxu1 %v3977_v0  ;;  %3356 = vmatprep.mubr.msk.f32.mxu0 %vm48_vm0, %v31_v10 }
  0x15   :  { %3357 = vmatmul.mubr.msk.f32.gmra.mxu0 %vm48_vm0, %v32_v11 }
  0x16   :  { %3359 = vmatprep.mubr.msk.f32.mxu0 %vm48_vm0, %v33_v12 }
  0x19   :  { %3360 = vmatmul.mubr.msk.f32.gmra.mxu0 %vm48_vm0, %v34_v13 }
  0x1a   :  { %3362 = vmatprep.mubr.msk.f32.mxu0 %vm48_vm0, %v35_v14 }
  0x1d   :  { %3363 = vmatmul.mubr.msk.f32.gmra.mxu0 %vm48_vm0, %v36_v36 }
  0x1e   :  { %3365 = vmatprep.mubr.msk.f32.mxu0 %vm48_vm0, %v37_v37 }
  0x21   :  { %3366 = vmatmul.mubr.msk.f32.gmra.mxu0 %vm48_vm0, %v38_v38 }
  0x22   :  { %3368 = vmatprep.mubr.msk.f32.mxu0 %vm48_vm0, %v39_v39 }
  0x25   :  { %3369 = vmatmul.mubr.msk.f32.gmra.mxu0 %vm48_vm0, %v40_v40 }
  0x26   :  { %3371 = vmatprep.mubr.msk.f32.mxu0 %vm48_vm0, %v41_v41 }
  0x29   :  { %3372 = vmatmul.mubr.msk.f32.gmra.mxu0 %vm48_vm0, %v42_v42 }
  0x2a   :  { %3423 = vmatprep.mubr.msk.f32.mxu0 %vm3978_vm1, %v3977_v0 }
  0xc4   :  { %v4121_v20 = vpop.f32.mrf.mxu0 }
  0xc5   :  { %v169_v43 = vadd.f32 %v4121_v20, %v4119_v19 }
  0xc6   :  { %v163_v21 = vpop.f32.mrf.mxu0 }
  0xc7   :  { %v164_v22 = vadd.f32 %v163_v21, %v4119_v19 }
  0xca   :  { %v339_v23 = vpop.f32.mrf.mxu1 }
  0xcb   :  { %v343_v24 = vadd.f32 %v339_v23, %v164_v22 }
  0xcc   :  { %v3384_v25 = vpop.f32.mrf.mxu1 }
  0xcd   :  { %3901 = vtanh.f32 %v343_v24 }
  0xd1   :  { %v3355_v56 = vpop.f32.mrf.mxu0 }
  0xd2   :  { %v179_v21 = vadd.f32 %v3355_v56, %v4119_v19 }
  0xd3   :  { %v173_v57 = vpop.f32.mrf.mxu0 }
  0xd4   :  { %v174_v11 = vadd.f32 %v173_v57, %v4119_v19 }
  0xd5   :  { %v4264_v58 = vpop.f32.mrf.mxu0 }
  0xd6   :  { %v189_v47 = vadd.f32 %v4264_v58, %v4119_v19 }
  0xd7   :  { %v4266_v59 = vpop.f32.mrf.mxu0 }
  0xd8   :  { %v184_v36 = vadd.f32 %v4266_v59, %v4119_v19 }
  0xd9   :  { %v4268_v60 = vpop.f32.mrf.mxu0 }
  0xda   :  { %v3902_v27 = vpop.eup %3901 }
  0xdb   :  { %3394 = vmatmul.mubr.msk.f32.vlgmr.msra.gmra.mxu1 %vm269_vm2, %v3902_v27  ;;  %v420_v35 = vsel %vm269_vm2, %v3902_v27, 0.0  ;;  %v4270_v61 = vpop.f32.mrf.mxu0 }
  0xdc   :  { %3397 = vmatpush3.msra.mxu1 %v4127_v26  ;;  %3412 = vmatprep.mubr.msk.f32.mxu1 %vm3978_vm1, %v3977_v0  ;;  %v194_v57 = vadd.f32 %v4270_v61, %v4119_v19 }
  0xdd   :  { %3398 = vmatprep.subr.mxu1 %v3977_v0  ;;  %v4272_v62 = vpop.f32.mrf.mxu0 }
  0xde   :  { %3399 = vmatpush3.msra.mxu1 %v4133_v28 }
  0xdf   :  { %3400 = vmatprep.subr.mxu1 %v3977_v0  ;;  %v4274_v63 = vpop.f32.mrf.mxu0 }
  0xe0   :  { %3401 = vmatpush3.msra.mxu1 %v4142_v29 }
  0xe1   :  { %3402 = vmatprep.subr.mxu1 %v3977_v0  ;;  %v4276_v1 = vpop.f32.mrf.mxu0 }
  0xe2   :  { %3403 = vmatpush3.msra.mxu1 %v4149_v30 }
  0xe3   :  { %3404 = vmatprep.subr.mxu1 %v3977_v0  ;;  %v4278_v3 = vpop.f32.mrf.mxu0 }
  0xe4   :  { %3405 = vmatpush3.msra.mxu1 %v4156_v31 }
  0xe5   :  { %3406 = vmatprep.subr.mxu1 %v3977_v0  ;;  %v4280_v4 = vpop.f32.mrf.mxu0 }
  0xe6   :  { %3407 = vmatpush3.msra.mxu1 %v4163_v32 }
  0xe7   :  { %3408 = vmatprep.subr.mxu1 %v3977_v0  ;;  %v4282_v8 = vpop.f32.mrf.mxu0 }
  0xe8   :  { %3409 = vmatpush3.msra.mxu1 %v4170_v33 }
  0xe9   :  { %3410 = vmatprep.subr.mxu1 %v3977_v0  ;;  %v4284_v9 = vpop.f32.mrf.mxu0 }
  0xea   :  { %3411 = vmatpush3.msra.mxu1 %v4177_v34 }
  0xeb   :  { %3413 = vmatmul.mubr.msk.f32.vlgmr.msra.gmra.mxu1 %vm421_vm3, %v420_v35  ;;  %3426 = vmatprep.subr.mxu1 %v3977_v0  ;;  %v4286_v10 = vpop.f32.mrf.mxu0 }
  0xec   :  { %3427 = vmatpush3.msra.mxu1 %v4127_v26  ;;  %3442 = vmatprep.mubr.msk.f32.mxu1 %vm3978_vm1, %v3977_v0 }
  0xed   :  { %3428 = vmatprep.subr.mxu1 %v3977_v0 }
  0xee   :  { %3429 = vmatpush3.msra.mxu1 %v4133_v28 }
  0xef   :  { %3430 = vmatprep.subr.mxu1 %v3977_v0 }
  0xf0   :  { %3431 = vmatpush3.msra.mxu1 %v4142_v29 }
  0xf1   :  { %3432 = vmatprep.subr.mxu1 %v3977_v0 }
  0xf2   :  { %3433 = vmatpush3.msra.mxu1 %v4149_v30 }
  0xf3   :  { %3434 = vmatprep.subr.mxu1 %v3977_v0 }
  0xf4   :  { %3435 = vmatpush3.msra.mxu1 %v4156_v31 }
  0xf5   :  { %3436 = vmatprep.subr.mxu1 %v3977_v0 }
  0xf6   :  { %3437 = vmatpush3.msra.mxu1 %v4163_v32 }
  0xf7   :  { %3438 = vmatprep.subr.mxu1 %v3977_v0 }
  0xf8   :  { %3439 = vmatpush3.msra.mxu1 %v4170_v33 }
  0xf9   :  { %3440 = vmatprep.subr.mxu1 %v3977_v0 }
  0xfa   :  { %3441 = vmatpush3.msra.mxu1 %v4177_v34 }
  0xfb   :  { %3475 = vmatprep.subr.mxu1 %v3977_v0 }
 0x19b   :  { %v414_v44 = vpop.f32.mrf.mxu1 }
 0x19c   :  { %v418_v45 = vadd.f32 %v414_v44, %v169_v43 }
 0x19d   :  { %v3395_v46 = vpop.f32.mrf.mxu1 }
 0x19e   :  { %3903 = vtanh.f32 %v418_v45 }
 0x1ab   :  { %v3904_v49 = vpop.eup %3903  ;;  %v491_v50 = vpop.f32.mrf.mxu1 }
 0x1ac   :  { %v492_v51 = vadd.f32 %v491_v50, %v4237_v48  ;;  %3424 = vmatmul.mubr.msk.f32.vlgmr.msra.gmra.mxu0 %vm269_vm2, %v3904_v49 }
 0x1ad   :  { %v3414_v52 = vpop.f32.mrf.mxu1  ;;  %3446 = vmatpush3.msra.mxu0 %v4027_v2  ;;  %3453 = vmatprep.mubr.msk.f32.mxu0 %vm3978_vm1, %v3977_v0 }
 0x1ae   :  { %3905 = vtanh.f32 %v492_v51  ;;  %3447 = vmatprep.subr.mxu0 %v3977_v0 }
 0x1af   :  { %3448 = vmatpush3.msra.mxu0 %v4041_v5 }
 0x1b0   :  { %3449 = vmatprep.subr.mxu0 %v3977_v0 }
 0x1b1   :  { %3450 = vmatpush3.msra.mxu0 %v4049_v6 }
 0x1b2   :  { %3451 = vmatprep.subr.mxu0 %v3977_v0 }
 0x1b3   :  { %3452 = vmatpush3.msra.mxu0 %v4057_v7 }
 0x1b4   :  { %3456 = vmatprep.subr.mxu0 %v3977_v0 }
 0x1bb   :  { %v3906_v53 = vpop.eup %3905 }
 0x1bc   :  { %572 = vrot.lane.b32.xlu0 %v3906_v53, %s3979_s0 }
 0x22e   :  { %v573_v54 = vpop.permute.xlu0 %572 }
 0x22f   :  { %v575_v55 = vsel %vm269_vm2, %v3904_v49, %v573_v54 }
 0x230   :  { %3443 = vmatmul.mubr.msk.f32.vlgmr.msra.gmra.mxu1 %vm421_vm3, %v575_v55 }
 0x231   :  { %3476 = vmatpush3.msra.mxu1 %v4027_v2  ;;  %3483 = vmatprep.mubr.msk.f32.mxu1 %vm3978_vm1, %v3977_v0 }
 0x232   :  { %3477 = vmatprep.subr.mxu1 %v3977_v0 }
 0x233   :  { %3478 = vmatpush3.msra.mxu1 %v4041_v5 }
 0x234   :  { %3479 = vmatprep.subr.mxu1 %v3977_v0 }
 0x235   :  { %3480 = vmatpush3.msra.mxu1 %v4049_v6 }
 0x236   :  { %3481 = vmatprep.subr.mxu1 %v3977_v0 }
 0x237   :  { %3482 = vmatpush3.msra.mxu1 %v4057_v7 }
 0x238   :  { %3486 = vmatprep.subr.mxu1 %v3977_v0 }
 0x26c   :  { %v565_v12 = vpop.f32.mrf.mxu0 }
 0x26d   :  { %v569_v13 = vadd.f32 %v565_v12, %v174_v11 }
 0x26e   :  { %v3425_v14 = vpop.f32.mrf.mxu0 }
 0x26f   :  { %3907 = vtanh.f32 %v569_v13 }
 0x27c   :  { %v3908_v15 = vpop.eup %3907 }
 0x27d   :  { %3454 = vmatmul.mubr.msk.f32.vlgmr.msra.gmra.mxu0 %vm269_vm2, %v3908_v15 }
 0x27e   :  { %3457 = vmatpush3.msra.mxu0 %v4127_v26  ;;  %3472 = vmatprep.mubr.msk.f32.mxu0 %vm3978_vm1, %v3977_v0 }
 0x27f   :  { %3458 = vmatprep.subr.mxu0 %v3977_v0 }
 0x280   :  { %3459 = vmatpush3.msra.mxu0 %v4133_v28 }
 0x281   :  { %3460 = vmatprep.subr.mxu0 %v3977_v0 }
 0x282   :  { %3461 = vmatpush3.msra.mxu0 %v4142_v29 }
 0x283   :  { %3462 = vmatprep.subr.mxu0 %v3977_v0 }
 0x284   :  { %3463 = vmatpush3.msra.mxu0 %v4149_v30 }
 0x285   :  { %3464 = vmatprep.subr.mxu0 %v3977_v0 }
 0x286   :  { %3465 = vmatpush3.msra.mxu0 %v4156_v31 }
 0x287   :  { %3466 = vmatprep.subr.mxu0 %v3977_v0 }
 0x288   :  { %3467 = vmatpush3.msra.mxu0 %v4163_v32 }
 0x289   :  { %3468 = vmatprep.subr.mxu0 %v3977_v0 }
 0x28a   :  { %3469 = vmatpush3.msra.mxu0 %v4170_v33 }
 0x28b   :  { %3470 = vmatprep.subr.mxu0 %v3977_v0 }
 0x28c   :  { %3471 = vmatpush3.msra.mxu0 %v4177_v34 }
 0x28d   :  { %3505 = vmatprep.subr.mxu0 %v3977_v0 }
 0x2f0   :  { %v645_v16 = vpop.f32.mrf.mxu1 }
 0x2f1   :  { %v646_v17 = vadd.f32 %v645_v16, %v4237_v48 }
 0x2f2   :  { %v3444_v18 = vpop.f32.mrf.mxu1 }
 0x2f3   :  { %3909 = vtanh.f32 %v646_v17  ;;  %v199_v17 = vadd.f32 %v4268_v60, %v4119_v19 }
 0x300   :  { %v3910_v20 = vpop.eup %3909 }
 0x301   :  { %726 = vrot.lane.b32.xlu0 %v3910_v20, %s3979_s0 }
 0x33d   :  { %v719_v22 = vpop.f32.mrf.mxu0 }
 0x33e   :  { %v723_v23 = vadd.f32 %v719_v22, %v179_v21 }
 0x33f   :  { %v3455_v24 = vpop.f32.mrf.mxu0 }
 0x340   :  { %3911 = vtanh.f32 %v723_v23 }
 0x34d   :  { %v4311_v25 = vpop.eup %3911 }
 0x34e   :  { %3484 = vmatmul.mubr.msk.f32.vlgmr.msra.gmra.mxu1 %vm269_vm2, %v4311_v25 }
 0x34f   :  { %3487 = vmatpush3.msra.mxu1 %v4127_v26  ;;  %3502 = vmatprep.mubr.msk.f32.mxu1 %vm3978_vm1, %v3977_v0 }
 0x350   :  { %3488 = vmatprep.subr.mxu1 %v3977_v0 }
 0x351   :  { %3489 = vmatpush3.msra.mxu1 %v4133_v28 }
 0x352   :  { %3490 = vmatprep.subr.mxu1 %v3977_v0 }
 0x353   :  { %3491 = vmatpush3.msra.mxu1 %v4142_v29 }
 0x354   :  { %3492 = vmatprep.subr.mxu1 %v3977_v0 }
 0x355   :  { %3493 = vmatpush3.msra.mxu1 %v4149_v30 }
 0x356   :  { %3494 = vmatprep.subr.mxu1 %v3977_v0 }
 0x357   :  { %3495 = vmatpush3.msra.mxu1 %v4156_v31 }
 0x358   :  { %3496 = vmatprep.subr.mxu1 %v3977_v0 }
 0x359   :  { %3497 = vmatpush3.msra.mxu1 %v4163_v32 }
 0x35a   :  { %3498 = vmatprep.subr.mxu1 %v3977_v0 }
 0x35b   :  { %3499 = vmatpush3.msra.mxu1 %v4170_v33 }
 0x35c   :  { %3500 = vmatprep.subr.mxu1 %v3977_v0 }
 0x35d   :  { %3501 = vmatpush3.msra.mxu1 %v4177_v34 }
 0x35e   :  { %3535 = vmatprep.subr.mxu1 %v3977_v0 }
 0x373   :  { %v727_v27 = vpop.permute.xlu0 %726 }
 0x374   :  { %v729_v35 = vsel %vm269_vm2, %v3908_v15, %v727_v27 }
 0x375   :  { %3473 = vmatmul.mubr.msk.f32.vlgmr.msra.gmra.mxu0 %vm421_vm3, %v729_v35 }
 0x376   :  { %3506 = vmatpush3.msra.mxu0 %v4027_v2  ;;  %3513 = vmatprep.mubr.msk.f32.mxu0 %vm3978_vm1, %v3977_v0 }
 0x377   :  { %3507 = vmatprep.subr.mxu0 %v3977_v0 }
 0x378   :  { %3508 = vmatpush3.msra.mxu0 %v4041_v5 }
 0x379   :  { %3509 = vmatprep.subr.mxu0 %v3977_v0 }
 0x37a   :  { %3510 = vmatpush3.msra.mxu0 %v4049_v6 }
 0x37b   :  { %3511 = vmatprep.subr.mxu0 %v3977_v0 }
 0x37c   :  { %3512 = vmatpush3.msra.mxu0 %v4057_v7 }
 0x37d   :  { %3516 = vmatprep.subr.mxu0 %v3977_v0 }
 0x40e   :  { %v873_v37 = vpop.f32.mrf.mxu1 }
 0x40f   :  { %v877_v38 = vadd.f32 %v873_v37, %v184_v36  ;;  %v204_v36 = vadd.f32 %v4274_v63, %v4119_v19 }
 0x410   :  { %v3485_v39 = vpop.f32.mrf.mxu1 }
 0x411   :  { %3913 = vtanh.f32 %v877_v38 }
 0x41e   :  { %v4347_v40 = vpop.eup %3913 }
 0x41f   :  { %3514 = vmatmul.mubr.msk.f32.vlgmr.msra.gmra.mxu0 %vm269_vm2, %v4347_v40 }
 0x420   :  { %3517 = vmatpush3.msra.mxu0 %v4127_v26  ;;  %3532 = vmatprep.mubr.msk.f32.mxu0 %vm3978_vm1, %v3977_v0 }
 0x421   :  { %3518 = vmatprep.subr.mxu0 %v3977_v0 }
 0x422   :  { %3519 = vmatpush3.msra.mxu0 %v4133_v28 }
 0x423   :  { %3520 = vmatprep.subr.mxu0 %v3977_v0 }
 0x424   :  { %3521 = vmatpush3.msra.mxu0 %v4142_v29 }
 0x425   :  { %3522 = vmatprep.subr.mxu0 %v3977_v0 }
 0x426   :  { %3523 = vmatpush3.msra.mxu0 %v4149_v30 }
 0x427   :  { %3524 = vmatprep.subr.mxu0 %v3977_v0 }
 0x428   :  { %3525 = vmatpush3.msra.mxu0 %v4156_v31 }
 0x429   :  { %3526 = vmatprep.subr.mxu0 %v3977_v0 }
 0x42a   :  { %3527 = vmatpush3.msra.mxu0 %v4163_v32 }
 0x42b   :  { %3528 = vmatprep.subr.mxu0 %v3977_v0 }
 0x42c   :  { %3529 = vmatpush3.msra.mxu0 %v4170_v33 }
 0x42d   :  { %3530 = vmatprep.subr.mxu0 %v3977_v0 }
 0x42e   :  { %3531 = vmatpush3.msra.mxu0 %v4177_v34 }
 0x42f   :  { %3565 = vmatprep.subr.mxu0 %v3977_v0 }
 0x435   :  { %v799_v41 = vpop.f32.mrf.mxu0 }
 0x436   :  { %v800_v42 = vadd.f32 %v799_v41, %v4237_v48 }
 0x437   :  { %v3474_v43 = vpop.f32.mrf.mxu0 }
 0x438   :  { %3915 = vtanh.f32 %v800_v42 }
 0x445   :  { %v3916_v44 = vpop.eup %3915 }
 0x446   :  { %880 = vrot.lane.b32.xlu1 %v3916_v44, %s3979_s0 }
 0x4b8   :  { %v881_v45 = vpop.permute.xlu1 %880 }
 0x4b9   :  { %v883_v46 = vsel %vm269_vm2, %v4311_v25, %v881_v45 }
 0x4ba   :  { %3503 = vmatmul.mubr.msk.f32.vlgmr.msra.gmra.mxu1 %vm421_vm3, %v883_v46  ;;  %v209_v46 = vadd.f32 %v4272_v62, %v4119_v19 }
 0x4bb   :  { %3536 = vmatpush3.msra.mxu1 %v4027_v2  ;;  %3543 = vmatprep.mubr.msk.f32.mxu1 %vm3978_vm1, %v3977_v0 }
 0x4bc   :  { %3537 = vmatprep.subr.mxu1 %v3977_v0 }
 0x4bd   :  { %3538 = vmatpush3.msra.mxu1 %v4041_v5 }
 0x4be   :  { %3539 = vmatprep.subr.mxu1 %v3977_v0 }
 0x4bf   :  { %3540 = vmatpush3.msra.mxu1 %v4049_v6 }
 0x4c0   :  { %3541 = vmatprep.subr.mxu1 %v3977_v0 }
 0x4c1   :  { %3542 = vmatpush3.msra.mxu1 %v4057_v7 }
 0x4c2   :  { %3546 = vmatprep.subr.mxu1 %v3977_v0 }
 0x4df   :  { %v1027_v49 = vpop.f32.mrf.mxu0 }
 0x4e0   :  { %v1031_v50 = vadd.f32 %v1027_v49, %v189_v47 }
 0x4e1   :  { %v3515_v51 = vpop.f32.mrf.mxu0 }
 0x4e2   :  { %3917 = vtanh.f32 %v1031_v50 }
 0x4ef   :  { %v4386_v52 = vpop.eup %3917 }
 0x4f0   :  { %3544 = vmatmul.mubr.msk.f32.vlgmr.msra.gmra.mxu1 %vm269_vm2, %v4386_v52 }
 0x4f1   :  { %3547 = vmatpush3.msra.mxu1 %v4127_v26  ;;  %3562 = vmatprep.mubr.msk.f32.mxu1 %vm3978_vm1, %v3977_v0 }
 0x4f2   :  { %3548 = vmatprep.subr.mxu1 %v3977_v0 }
 0x4f3   :  { %3549 = vmatpush3.msra.mxu1 %v4133_v28 }
 0x4f4   :  { %3550 = vmatprep.subr.mxu1 %v3977_v0 }
 0x4f5   :  { %3551 = vmatpush3.msra.mxu1 %v4142_v29 }
 0x4f6   :  { %3552 = vmatprep.subr.mxu1 %v3977_v0 }
 0x4f7   :  { %3553 = vmatpush3.msra.mxu1 %v4149_v30 }
 0x4f8   :  { %3554 = vmatprep.subr.mxu1 %v3977_v0 }
 0x4f9   :  { %3555 = vmatpush3.msra.mxu1 %v4156_v31 }
 0x4fa   :  { %3556 = vmatprep.subr.mxu1 %v3977_v0 }
 0x4fb   :  { %3557 = vmatpush3.msra.mxu1 %v4163_v32 }
 0x4fc   :  { %3558 = vmatprep.subr.mxu1 %v3977_v0 }
 0x4fd   :  { %3559 = vmatpush3.msra.mxu1 %v4170_v33 }
 0x4fe   :  { %3560 = vmatprep.subr.mxu1 %v3977_v0 }
 0x4ff   :  { %3561 = vmatpush3.msra.mxu1 %v4177_v34 }
 0x500   :  { %3595 = vmatprep.subr.mxu1 %v3977_v0 }
 0x57a   :  { %v953_v53 = vpop.f32.mrf.mxu1 }
 0x57b   :  { %v954_v54 = vadd.f32 %v953_v53, %v4237_v48 }
 0x57c   :  { %v3504_v55 = vpop.f32.mrf.mxu1 }
 0x57d   :  { %3919 = vtanh.f32 %v954_v54 }
 0x58a   :  { %v3920_v56 = vpop.eup %3919 }
 0x58b   :  { %1034 = vrot.lane.b32.xlu1 %v3920_v56, %s3979_s0 }
 0x5b0   :  { %v1181_v58 = vpop.f32.mrf.mxu1 }
 0x5b1   :  { %v1185_v59 = vadd.f32 %v1181_v58, %v194_v57  ;;  %v214_v57 = vadd.f32 %v4278_v3, %v4119_v19 }
 0x5b2   :  { %v3545_v11 = vpop.f32.mrf.mxu1 }
 0x5b3   :  { %3921 = vtanh.f32 %v1185_v59 }
 0x5c0   :  { %v4423_v61 = vpop.eup %3921 }
 0x5fd   :  { %v1035_v12 = vpop.permute.xlu1 %1034 }
 0x5fe   :  { %v1037_v13 = vsel %vm269_vm2, %v4347_v40, %v1035_v12 }
 0x5ff   :  { %3533 = vmatmul.mubr.msk.f32.vlgmr.msra.gmra.mxu0 %vm421_vm3, %v1037_v13 }
 0x600   :  { %3566 = vmatpush3.msra.mxu0 %v4027_v2  ;;  %3573 = vmatprep.mubr.msk.f32.mxu0 %vm3978_vm1, %v3977_v0 }
 0x601   :  { %3567 = vmatprep.subr.mxu0 %v3977_v0 }
 0x602   :  { %3568 = vmatpush3.msra.mxu0 %v4041_v5 }
 0x603   :  { %3569 = vmatprep.subr.mxu0 %v3977_v0 }
 0x604   :  { %3570 = vmatpush3.msra.mxu0 %v4049_v6 }
 0x605   :  { %3571 = vmatprep.subr.mxu0 %v3977_v0 }
 0x606   :  { %3572 = vmatpush3.msra.mxu0 %v4057_v7 }
 0x607   :  { %3574 = vmatmul.mubr.msk.f32.vlgmr.msra.gmra.mxu0 %vm269_vm2, %v4423_v61  ;;  %3576 = vmatprep.subr.mxu0 %v3977_v0 }
 0x608   :  { %3577 = vmatpush3.msra.mxu0 %v4127_v26  ;;  %3592 = vmatprep.mubr.msk.f32.mxu0 %vm3978_vm1, %v3977_v0 }
 0x609   :  { %3578 = vmatprep.subr.mxu0 %v3977_v0 }
 0x60a   :  { %3579 = vmatpush3.msra.mxu0 %v4133_v28 }
 0x60b   :  { %3580 = vmatprep.subr.mxu0 %v3977_v0 }
 0x60c   :  { %3581 = vmatpush3.msra.mxu0 %v4142_v29 }
 0x60d   :  { %3582 = vmatprep.subr.mxu0 %v3977_v0 }
 0x60e   :  { %3583 = vmatpush3.msra.mxu0 %v4149_v30 }
 0x60f   :  { %3584 = vmatprep.subr.mxu0 %v3977_v0 }
 0x610   :  { %3585 = vmatpush3.msra.mxu0 %v4156_v31 }
 0x611   :  { %3586 = vmatprep.subr.mxu0 %v3977_v0 }
 0x612   :  { %3587 = vmatpush3.msra.mxu0 %v4163_v32 }
 0x613   :  { %3588 = vmatprep.subr.mxu0 %v3977_v0 }
 0x614   :  { %3589 = vmatpush3.msra.mxu0 %v4170_v33 }
 0x615   :  { %3590 = vmatprep.subr.mxu0 %v3977_v0 }
 0x616   :  { %3591 = vmatpush3.msra.mxu0 %v4177_v34 }
 0x617   :  { %3625 = vmatprep.subr.mxu0 %v3977_v0 }
 0x6bf   :  { %v1107_v14 = vpop.f32.mrf.mxu0 }
 0x6c0   :  { %v1108_v15 = vadd.f32 %v1107_v14, %v4237_v48 }
 0x6c1   :  { %v3534_v16 = vpop.f32.mrf.mxu0 }
 0x6c2   :  { %3923 = vtanh.f32 %v1108_v15 }
 0x6c7   :  { %v1335_v18 = vpop.f32.mrf.mxu0 }
 0x6c8   :  { %v1339_v20 = vadd.f32 %v1335_v18, %v199_v17 }
 0x6c9   :  { %v3575_v21 = vpop.f32.mrf.mxu0 }
 0x6ca   :  { %3925 = vtanh.f32 %v1339_v20  ;;  %v4613_v21 = vld [vmem:[%s4930_s2 + $0x18] sm:$0xff] }
 0x6cf   :  { %v3924_v22 = vpop.eup %3923 }
 0x6d0   :  { %1188 = vrot.lane.b32.xlu0 %v3924_v22, %s3979_s0  ;;  %v4629_v22 = vld [vmem:[%s4930_s2 + $0x8] sm:$0xff] }
 0x6d7   :  { %v4462_v60 = vpop.eup %3925 }
 0x742   :  { %v1189_v23 = vpop.permute.xlu0 %1188 }
 0x743   :  { %v1191_v24 = vsel %vm269_vm2, %v4386_v52, %v1189_v23 }
 0x744   :  { %3563 = vmatmul.mubr.msk.f32.vlgmr.msra.gmra.mxu1 %vm421_vm3, %v1191_v24  ;;  %v4638_v24 = vld [vmem:[%s4930_s2] sm:$0xff] }
 0x745   :  { %3596 = vmatpush3.msra.mxu1 %v4027_v2  ;;  %3603 = vmatprep.mubr.msk.f32.mxu1 %vm3978_vm1, %v3977_v0 }
 0x746   :  { %3597 = vmatprep.subr.mxu1 %v3977_v0 }
 0x747   :  { %3598 = vmatpush3.msra.mxu1 %v4041_v5 }
 0x748   :  { %3599 = vmatprep.subr.mxu1 %v3977_v0 }
 0x749   :  { %3600 = vmatpush3.msra.mxu1 %v4049_v6 }
 0x74a   :  { %3601 = vmatprep.subr.mxu1 %v3977_v0 }
 0x74b   :  { %3602 = vmatpush3.msra.mxu1 %v4057_v7 }
 0x74c   :  { %3604 = vmatmul.mubr.msk.f32.vlgmr.msra.gmra.mxu1 %vm269_vm2, %v4462_v60  ;;  %3606 = vmatprep.subr.mxu1 %v3977_v0 }
 0x74d   :  { %3607 = vmatpush3.msra.mxu1 %v4127_v26  ;;  %3622 = vmatprep.mubr.msk.f32.mxu1 %vm3978_vm1, %v3977_v0 }
 0x74e   :  { %3608 = vmatprep.subr.mxu1 %v3977_v0 }
 0x74f   :  { %3609 = vmatpush3.msra.mxu1 %v4133_v28 }
 0x750   :  { %3610 = vmatprep.subr.mxu1 %v3977_v0 }
 0x751   :  { %3611 = vmatpush3.msra.mxu1 %v4142_v29 }
 0x752   :  { %3612 = vmatprep.subr.mxu1 %v3977_v0 }
 0x753   :  { %3613 = vmatpush3.msra.mxu1 %v4149_v30 }
 0x754   :  { %3614 = vmatprep.subr.mxu1 %v3977_v0 }
 0x755   :  { %3615 = vmatpush3.msra.mxu1 %v4156_v31 }
 0x756   :  { %3616 = vmatprep.subr.mxu1 %v3977_v0 }
 0x757   :  { %3617 = vmatpush3.msra.mxu1 %v4163_v32 }
 0x758   :  { %3618 = vmatprep.subr.mxu1 %v3977_v0 }
 0x759   :  { %3619 = vmatpush3.msra.mxu1 %v4170_v33 }
 0x75a   :  { %3620 = vmatprep.subr.mxu1 %v3977_v0 }
 0x75b   :  { %3621 = vmatpush3.msra.mxu1 %v4177_v34 }
 0x75c   :  { %3655 = vmatprep.subr.mxu1 %v3977_v0 }
 0x804   :  { %v1261_v25 = vpop.f32.mrf.mxu1 }
 0x805   :  { %v1262_v27 = vadd.f32 %v1261_v25, %v4237_v48 }
 0x806   :  { %v3564_v35 = vpop.f32.mrf.mxu1 }
 0x807   :  { %3927 = vtanh.f32 %v1262_v27  ;;  %v4683_v27 = vld [vmem:[%s4933_s4 + $0x38] sm:$0xff]  ;;  %v4692_v35 = vld [vmem:[%s4933_s4 + $0x30] sm:$0xff] }
 0x80c   :  { %v1489_v37 = vpop.f32.mrf.mxu1 }
 0x80d   :  { %v1493_v38 = vadd.f32 %v1489_v37, %v204_v36  ;;  %v4699_v36 = vld [vmem:[%s4933_s4 + $0x28] sm:$0xff]  ;;  %v4706_v37 = vld [vmem:[%s4933_s4 + $0x20] sm:$0xff] }
 0x80e   :  { %v3605_v39 = vpop.f32.mrf.mxu1 }
 0x80f   :  { %3929 = vtanh.f32 %v1493_v38  ;;  %v4713_v38 = vld [vmem:[%s4933_s4 + $0x18] sm:$0xff]  ;;  %v4720_v39 = vld [vmem:[%s4933_s4 + $0x10] sm:$0xff] }
 0x814   :  { %v3928_v40 = vpop.eup %3927 }
 0x815   :  { %1342 = vrot.lane.b32.xlu1 %v3928_v40, %s3979_s0  ;;  %v4727_v40 = vld [vmem:[%s4933_s4 + $0x8] sm:$0xff] }
 0x81c   :  { %v4501_v63 = vpop.eup %3929 }
 0x887   :  { %v1343_v41 = vpop.permute.xlu1 %1342 }
 0x888   :  { %v1345_v42 = vsel %vm269_vm2, %v4423_v61, %v1343_v41  ;;  %v4734_v41 = vld [vmem:[%s4933_s4] sm:$0xff] }
 0x889   :  { %3593 = vmatmul.mubr.msk.f32.vlgmr.msra.gmra.mxu0 %vm421_vm3, %v1345_v42 }
 0x88a   :  { %3626 = vmatpush3.msra.mxu0 %v4027_v2  ;;  %3633 = vmatprep.mubr.msk.f32.mxu0 %vm3978_vm1, %v3977_v0 }
 0x88b   :  { %3627 = vmatprep.subr.mxu0 %v3977_v0 }
 0x88c   :  { %3628 = vmatpush3.msra.mxu0 %v4041_v5 }
 0x88d   :  { %3629 = vmatprep.subr.mxu0 %v3977_v0 }
 0x88e   :  { %3630 = vmatpush3.msra.mxu0 %v4049_v6 }
 0x88f   :  { %3631 = vmatprep.subr.mxu0 %v3977_v0 }
 0x890   :  { %3632 = vmatpush3.msra.mxu0 %v4057_v7 }
 0x891   :  { %3634 = vmatmul.mubr.msk.f32.vlgmr.msra.gmra.mxu0 %vm269_vm2, %v4501_v63  ;;  %3636 = vmatprep.subr.mxu0 %v3977_v0 }
 0x892   :  { %3637 = vmatpush3.msra.mxu0 %v4127_v26  ;;  %3652 = vmatprep.mubr.msk.f32.mxu0 %vm3978_vm1, %v3977_v0 }
 0x893   :  { %3638 = vmatprep.subr.mxu0 %v3977_v0 }
 0x894   :  { %3639 = vmatpush3.msra.mxu0 %v4133_v28 }
 0x895   :  { %3640 = vmatprep.subr.mxu0 %v3977_v0 }
 0x896   :  { %3641 = vmatpush3.msra.mxu0 %v4142_v29 }
 0x897   :  { %3642 = vmatprep.subr.mxu0 %v3977_v0 }
 0x898   :  { %3643 = vmatpush3.msra.mxu0 %v4149_v30 }
 0x899   :  { %3644 = vmatprep.subr.mxu0 %v3977_v0 }
 0x89a   :  { %3645 = vmatpush3.msra.mxu0 %v4156_v31 }
 0x89b   :  { %3646 = vmatprep.subr.mxu0 %v3977_v0 }
 0x89c   :  { %3647 = vmatpush3.msra.mxu0 %v4163_v32 }
 0x89d   :  { %3648 = vmatprep.subr.mxu0 %v3977_v0 }
 0x89e   :  { %3649 = vmatpush3.msra.mxu0 %v4170_v33 }
 0x89f   :  { %3650 = vmatprep.subr.mxu0 %v3977_v0 }
 0x8a0   :  { %3651 = vmatpush3.msra.mxu0 %v4177_v34 }
 0x8a1   :  { %3685 = vmatprep.subr.mxu0 %v3977_v0 }
 0x949   :  { %v1415_v43 = vpop.f32.mrf.mxu0 }
 0x94a   :  { %v1416_v44 = vadd.f32 %v1415_v43, %v4237_v48 }
 0x94b   :  { %v3594_v45 = vpop.f32.mrf.mxu0 }
 0x94c   :  { %3931 = vtanh.f32 %v1416_v44  ;;  %v229_v44 = vadd.f32 %v4280_v4, %v4119_v19 }
 0x951   :  { %v1643_v47 = vpop.f32.mrf.mxu0 }
 0x952   :  { %v1647_v49 = vadd.f32 %v1643_v47, %v209_v46 }
 0x953   :  { %v3635_v50 = vpop.f32.mrf.mxu0 }
 0x954   :  { %3933 = vtanh.f32 %v1647_v49 }
 0x959   :  { %v3932_v51 = vpop.eup %3931 }
 0x95a   :  { %1496 = vrot.lane.b32.xlu0 %v3932_v51, %s3979_s0 }
 0x961   :  { %v4540_v62 = vpop.eup %3933 }
 0x9cc   :  { %v1497_v52 = vpop.permute.xlu0 %1496 }
 0x9cd   :  { %v1499_v53 = vsel %vm269_vm2, %v4462_v60, %v1497_v52 }
 0x9ce   :  { %3623 = vmatmul.mubr.msk.f32.vlgmr.msra.gmra.mxu1 %vm421_vm3, %v1499_v53 }
 0x9cf   :  { %3656 = vmatpush3.msra.mxu1 %v4027_v2  ;;  %3663 = vmatprep.mubr.msk.f32.mxu1 %vm3978_vm1, %v3977_v0 }
 0x9d0   :  { %3657 = vmatprep.subr.mxu1 %v3977_v0 }
 0x9d1   :  { %3658 = vmatpush3.msra.mxu1 %v4041_v5 }
 0x9d2   :  { %3659 = vmatprep.subr.mxu1 %v3977_v0 }
 0x9d3   :  { %3660 = vmatpush3.msra.mxu1 %v4049_v6 }
 0x9d4   :  { %3661 = vmatprep.subr.mxu1 %v3977_v0 }
 0x9d5   :  { %3662 = vmatpush3.msra.mxu1 %v4057_v7 }
 0x9d6   :  { %3664 = vmatmul.mubr.msk.f32.vlgmr.msra.gmra.mxu1 %vm269_vm2, %v4540_v62  ;;  %3666 = vmatprep.subr.mxu1 %v3977_v0 }
 0x9d7   :  { %3667 = vmatpush3.msra.mxu1 %v4127_v26  ;;  %3682 = vmatprep.mubr.msk.f32.mxu1 %vm3978_vm1, %v3977_v0 }
 0x9d8   :  { %3668 = vmatprep.subr.mxu1 %v3977_v0 }
 0x9d9   :  { %3669 = vmatpush3.msra.mxu1 %v4133_v28 }
 0x9da   :  { %3670 = vmatprep.subr.mxu1 %v3977_v0 }
 0x9db   :  { %3671 = vmatpush3.msra.mxu1 %v4142_v29 }
 0x9dc   :  { %3672 = vmatprep.subr.mxu1 %v3977_v0 }
 0x9dd   :  { %3673 = vmatpush3.msra.mxu1 %v4149_v30 }
 0x9de   :  { %3674 = vmatprep.subr.mxu1 %v3977_v0 }
 0x9df   :  { %3675 = vmatpush3.msra.mxu1 %v4156_v31 }
 0x9e0   :  { %3676 = vmatprep.subr.mxu1 %v3977_v0 }
 0x9e1   :  { %3677 = vmatpush3.msra.mxu1 %v4163_v32 }
 0x9e2   :  { %3678 = vmatprep.subr.mxu1 %v3977_v0 }
 0x9e3   :  { %3679 = vmatpush3.msra.mxu1 %v4170_v33 }
 0x9e4   :  { %3680 = vmatprep.subr.mxu1 %v3977_v0 }
 0x9e5   :  { %3681 = vmatpush3.msra.mxu1 %v4177_v34 }
 0x9e6   :  { %3715 = vmatprep.subr.mxu1 %v3977_v0 }
 0xa8e   :  { %v1569_v54 = vpop.f32.mrf.mxu1 }
 0xa8f   :  { %v1570_v55 = vadd.f32 %v1569_v54, %v4237_v48 }
 0xa90   :  { %v3624_v56 = vpop.f32.mrf.mxu1 }
 0xa91   :  { %3935 = vtanh.f32 %v1570_v55  ;;  %v4772_v56 = vld [vmem:[%s4934_s5 + $0x18] sm:$0xff] }
 0xa96   :  { %v1797_v58 = vpop.f32.mrf.mxu1 }
 0xa97   :  { %v1801_v59 = vadd.f32 %v1797_v58, %v214_v57  ;;  %v4777_v57 = vld [vmem:[%s4934_s5 + $0x10] sm:$0xff]  ;;  %v4784_v58 = vld [vmem:[%s4934_s5 + $0x8] sm:$0xff] }
 0xa98   :  { %v3665_v11 = vpop.f32.mrf.mxu1 }
 0xa99   :  { %3937 = vtanh.f32 %v1801_v59  ;;  %v4791_v59 = vld [vmem:[%s4934_s5] sm:$0xff] }
 0xa9e   :  { %v3936_v12 = vpop.eup %3935 }
 0xa9f   :  { %1650 = vrot.lane.b32.xlu1 %v3936_v12, %s3979_s0 }
 0xaa6   :  { %v4579_v3 = vpop.eup %3937 }
 0xb11   :  { %v1651_v13 = vpop.permute.xlu1 %1650 }
 0xb12   :  { %v1653_v61 = vsel %vm269_vm2, %v4501_v63, %v1651_v13 }
 0xb13   :  { %3653 = vmatmul.mubr.msk.f32.vlgmr.msra.gmra.mxu0 %vm421_vm3, %v1653_v61 }
 0xb14   :  { %3686 = vmatpush3.msra.mxu0 %v4027_v2  ;;  %3693 = vmatprep.mubr.msk.f32.mxu0 %vm3978_vm1, %v3977_v0 }
 0xb15   :  { %3687 = vmatprep.subr.mxu0 %v3977_v0 }
 0xb16   :  { %3688 = vmatpush3.msra.mxu0 %v4041_v5 }
 0xb17   :  { %3689 = vmatprep.subr.mxu0 %v3977_v0 }
 0xb18   :  { %3690 = vmatpush3.msra.mxu0 %v4049_v6 }
 0xb19   :  { %3691 = vmatprep.subr.mxu0 %v3977_v0 }
 0xb1a   :  { %3692 = vmatpush3.msra.mxu0 %v4057_v7  ;;  %v219_v7 = vadd.f32 %v4276_v1, %v4119_v19  ;;  %v4622_v1 = vld [vmem:[%s4930_s2 + $0x10] sm:$0xff] }
 0xb1b   :  { %3694 = vmatmul.mubr.msk.f32.vlgmr.msra.gmra.mxu0 %vm269_vm2, %v4579_v3  ;;  %3696 = vmatprep.subr.mxu0 %v3977_v0 }
 0xb1c   :  { %3697 = vmatpush3.msra.mxu0 %v4127_v26  ;;  %3712 = vmatprep.mubr.msk.f32.mxu0 %vm3978_vm1, %v3977_v0 }
 0xb1d   :  { %3698 = vmatprep.subr.mxu0 %v3977_v0 }
 0xb1e   :  { %3699 = vmatpush3.msra.mxu0 %v4133_v28 }
 0xb1f   :  { %3700 = vmatprep.subr.mxu0 %v3977_v0 }
 0xb20   :  { %3701 = vmatpush3.msra.mxu0 %v4142_v29 }
 0xb21   :  { %3702 = vmatprep.subr.mxu0 %v3977_v0 }
 0xb22   :  { %3703 = vmatpush3.msra.mxu0 %v4149_v30 }
 0xb23   :  { %3704 = vmatprep.subr.mxu0 %v3977_v0 }
 0xb24   :  { %3705 = vmatpush3.msra.mxu0 %v4156_v31 }
 0xb25   :  { %3706 = vmatprep.subr.mxu0 %v3977_v0 }
 0xb26   :  { %3707 = vmatpush3.msra.mxu0 %v4163_v32 }
 0xb27   :  { %3708 = vmatprep.subr.mxu0 %v3977_v0 }
 0xb28   :  { %3709 = vmatpush3.msra.mxu0 %v4170_v33 }
 0xb29   :  { %3710 = vmatprep.subr.mxu0 %v3977_v0 }
 0xb2a   :  { %3711 = vmatpush3.msra.mxu0 %v4177_v34 }
 0xb2b   :  { %3745 = vmatprep.subr.mxu0 %v3977_v0 }
 0xbd3   :  { %v1723_v2 = vpop.f32.mrf.mxu0 }
 0xbd4   :  { %v1724_v5 = vadd.f32 %v1723_v2, %v4237_v48 }
 0xbd5   :  { %v3654_v6 = vpop.f32.mrf.mxu0 }
 0xbd6   :  { %3939 = vtanh.f32 %v1724_v5  ;;  %v4844_v6 = vld [vmem:[%s4935_s6] ss:$0 sm:$0xff] }
 0xbdb   :  { %v1951_v14 = vpop.f32.mrf.mxu0 }
 0xbdc   :  { %v1955_v15 = vadd.f32 %v1951_v14, %v219_v7 }
 0xbdd   :  { %v3695_v16 = vpop.f32.mrf.mxu0 }
 0xbde   :  { %3941 = vtanh.f32 %v1955_v15 }
 0xbe3   :  { %v3940_v17 = vpop.eup %3939 }
 0xbe4   :  { %1804 = vrot.lane.b32.xlu0 %v3940_v17, %s3979_s0 }
 0xbeb   :  { %v4633_v23 = vpop.eup %3941 }
 0xc56   :  { %v1805_v18 = vpop.permute.xlu0 %1804 }
 0xc57   :  { %v1807_v20 = vsel %vm269_vm2, %v4540_v62, %v1805_v18 }
 0xc58   :  { %3683 = vmatmul.mubr.msk.f32.vlgmr.msra.gmra.mxu1 %vm421_vm3, %v1807_v20 }
 0xc59   :  { %3716 = vmatpush3.msra.mxu1 %v4613_v21  ;;  %3723 = vmatprep.mubr.msk.f32.mxu1 %vm3978_vm1, %v3977_v0 }
 0xc5a   :  { %3717 = vmatprep.subr.mxu1 %v3977_v0 }
 0xc5b   :  { %3718 = vmatpush3.msra.mxu1 %v4622_v1 }
 0xc5c   :  { %3719 = vmatprep.subr.mxu1 %v3977_v0 }
 0xc5d   :  { %3720 = vmatpush3.msra.mxu1 %v4629_v22 }
 0xc5e   :  { %3721 = vmatprep.subr.mxu1 %v3977_v0 }
 0xc5f   :  { %3722 = vmatpush3.msra.mxu1 %v4638_v24 }
 0xc60   :  { %3724 = vmatmul.mubr.msk.f32.vlgmr.msra.gmra.mxu1 %vm269_vm2, %v4633_v23  ;;  %3726 = vmatprep.subr.mxu1 %v3977_v0 }
 0xc61   :  { %3727 = vmatpush3.msra.mxu1 %v4127_v26  ;;  %3742 = vmatprep.mubr.msk.f32.mxu1 %vm3978_vm1, %v3977_v0 }
 0xc62   :  { %3728 = vmatprep.subr.mxu1 %v3977_v0 }
 0xc63   :  { %3729 = vmatpush3.msra.mxu1 %v4133_v28 }
 0xc64   :  { %3730 = vmatprep.subr.mxu1 %v3977_v0 }
 0xc65   :  { %3731 = vmatpush3.msra.mxu1 %v4142_v29 }
 0xc66   :  { %3732 = vmatprep.subr.mxu1 %v3977_v0 }
 0xc67   :  { %3733 = vmatpush3.msra.mxu1 %v4149_v30  ;;  %v224_v30 = vadd.f32 %v4282_v8, %v4119_v19 }
 0xc68   :  { %3734 = vmatprep.subr.mxu1 %v3977_v0 }
 0xc69   :  { %3735 = vmatpush3.msra.mxu1 %v4156_v31 }
 0xc6a   :  { %3736 = vmatprep.subr.mxu1 %v3977_v0 }
 0xc6b   :  { %3737 = vmatpush3.msra.mxu1 %v4163_v32 }
 0xc6c   :  { %3738 = vmatprep.subr.mxu1 %v3977_v0 }
 0xc6d   :  { %3739 = vmatpush3.msra.mxu1 %v4170_v33 }
 0xc6e   :  { %3740 = vmatprep.subr.mxu1 %v3977_v0 }
 0xc6f   :  { %3741 = vmatpush3.msra.mxu1 %v4177_v34 }
 0xc70   :  { %3775 = vmatprep.subr.mxu1 %v3977_v0 }
 0xd18   :  { %v1877_v26 = vpop.f32.mrf.mxu1 }
 0xd19   :  { %v1878_v28 = vadd.f32 %v1877_v26, %v4237_v48  ;;  %v234_v26 = vadd.f32 %v4286_v10, %v4119_v19 }
 0xd1a   :  { %v3684_v29 = vpop.f32.mrf.mxu1 }
 0xd1b   :  { %3943 = vtanh.f32 %v1878_v28 }
 0xd20   :  { %v2105_v31 = vpop.f32.mrf.mxu1 }
 0xd21   :  { %v2109_v32 = vadd.f32 %v2105_v31, %v224_v30  ;;  %v239_v31 = vadd.f32 %v4284_v9, %v4119_v19 }
 0xd22   :  { %v3725_v60 = vpop.f32.mrf.mxu1 }
 0xd23   :  { %3945 = vtanh.f32 %v2109_v32 }
 0xd28   :  { %v3944_v25 = vpop.eup %3943 }
 0xd29   :  { %1958 = vrot.lane.b32.xlu1 %v3944_v25, %s3979_s0 }
 0xd30   :  { %v3946_v8 = vpop.eup %3945 }
 0xd9b   :  { %v1959_v33 = vpop.permute.xlu1 %1958 }
 0xd9c   :  { %v1961_v34 = vsel %vm269_vm2, %v4579_v3, %v1959_v33 }
 0xd9d   :  { %3713 = vmatmul.mubr.msk.f32.vlgmr.msra.gmra.mxu0 %vm421_vm3, %v1961_v34 }
 0xd9e   :  { %3746 = vmatpush3.msra.mxu0 %v4613_v21  ;;  %3753 = vmatprep.mubr.msk.f32.mxu0 %vm3978_vm1, %v3977_v0 }
 0xd9f   :  { %3747 = vmatprep.subr.mxu0 %v3977_v0 }
 0xda0   :  { %3748 = vmatpush3.msra.mxu0 %v4622_v1 }
 0xda1   :  { %3749 = vmatprep.subr.mxu0 %v3977_v0 }
 0xda2   :  { %3750 = vmatpush3.msra.mxu0 %v4629_v22 }
 0xda3   :  { %3751 = vmatprep.subr.mxu0 %v3977_v0 }
 0xda4   :  { %3752 = vmatpush3.msra.mxu0 %v4638_v24 }
 0xda5   :  { %3754 = vmatmul.mubr.msk.f32.vlgmr.msra.gmra.mxu0 %vm269_vm2, %v3946_v8  ;;  %3756 = vmatprep.subr.mxu0 %v3977_v0 }
 0xda6   :  { %3757 = vmatpush3.msra.mxu0 %v4683_v27  ;;  %3772 = vmatprep.mubr.msk.f32.mxu0 %vm3978_vm1, %v3977_v0 }
 0xda7   :  { %3758 = vmatprep.subr.mxu0 %v3977_v0 }
 0xda8   :  { %3759 = vmatpush3.msra.mxu0 %v4692_v35 }
 0xda9   :  { %3760 = vmatprep.subr.mxu0 %v3977_v0 }
 0xdaa   :  { %3761 = vmatpush3.msra.mxu0 %v4699_v36 }
 0xdab   :  { %3762 = vmatprep.subr.mxu0 %v3977_v0 }
 0xdac   :  { %3763 = vmatpush3.msra.mxu0 %v4706_v37 }
 0xdad   :  { %3764 = vmatprep.subr.mxu0 %v3977_v0 }
 0xdae   :  { %3765 = vmatpush3.msra.mxu0 %v4713_v38 }
 0xdaf   :  { %3766 = vmatprep.subr.mxu0 %v3977_v0 }
 0xdb0   :  { %3767 = vmatpush3.msra.mxu0 %v4720_v39 }
 0xdb1   :  { %3768 = vmatprep.subr.mxu0 %v3977_v0 }
 0xdb2   :  { %3769 = vmatpush3.msra.mxu0 %v4727_v40 }
 0xdb3   :  { %3770 = vmatprep.subr.mxu0 %v3977_v0 }
 0xdb4   :  { %3771 = vmatpush3.msra.mxu0 %v4734_v41 }
 0xdb5   :  { %3797 = vmatprep.subr.mxu0 %v3977_v0 }
 0xe5d   :  { %v2031_v42 = vpop.f32.mrf.mxu0 }
 0xe5e   :  { %v2032_v63 = vadd.f32 %v2031_v42, %v4237_v48 }
 0xe5f   :  { %v3714_v43 = vpop.f32.mrf.mxu0 }
 0xe60   :  { %3947 = vtanh.f32 %v2032_v63 }
 0xe65   :  { %v2259_v45 = vpop.f32.mrf.mxu0 }
 0xe66   :  { %v2263_v46 = vadd.f32 %v2259_v45, %v229_v44 }
 0xe67   :  { %v3755_v47 = vpop.f32.mrf.mxu0 }
 0xe6d   :  { %v3948_v49 = vpop.eup %3947 }
 0xe6e   :  { %2112 = vrot.lane.b32.xlu0 %v3948_v49, %s3979_s0 }
 0xee0   :  { %v2113_v50 = vpop.permute.xlu0 %2112 }
 0xee1   :  { %v2115_v51 = vsel %vm269_vm2, %v4633_v23, %v2113_v50 }
 0xee2   :  { %3743 = vmatmul.mubr.msk.f32.vlgmr.msra.gmra.mxu1 %vm421_vm3, %v2115_v51 }
 0xee3   :  { %3783 = vmatprep.mubr.msk.f32.mxu1 %vm3978_vm1, %v3977_v0  ;;  %3776 = vmatpush3.msra.mxu1 %v4772_v56 }
 0xee4   :  { %3777 = vmatprep.subr.mxu1 %v3977_v0 }
 0xee5   :  { %3778 = vmatpush3.msra.mxu1 %v4777_v57 }
 0xee6   :  { %3779 = vmatprep.subr.mxu1 %v3977_v0 }
 0xee7   :  { %3780 = vmatpush3.msra.mxu1 %v4784_v58 }
 0xee8   :  { %3781 = vmatprep.subr.mxu1 %v3977_v0 }
 0xee9   :  { %3782 = vmatpush3.msra.mxu1 %v4791_v59 }
 0xeea   :  { %3786 = vmatprep.subr.mxu1 %v3977_v0 }
 0xfa2   :  { %v2185_v52 = vpop.f32.mrf.mxu1 }
 0xfa3   :  { %v2186_v53 = vadd.f32 %v2185_v52, %v4237_v48 }
 0xfa4   :  { %v3744_v62 = vpop.f32.mrf.mxu1 }
 0xfa5   :  { %3949 = vtanh.f32 %v2186_v53 }
 0xfb2   :  { %v3950_v4 = vpop.eup %3949 }
 0xfb3   :  { %2266 = vrot.lane.b32.xlu1 %v3950_v4, %s3979_s0 }
0x1025   :  { %v2267_v54 = vpop.permute.xlu1 %2266 }
0x1026   :  { %v2269_v55 = vsel %vm269_vm2, %v3946_v8, %v2267_v54 }
0x1027   :  { %3773 = vmatmul.mubr.msk.f32.vlgmr.msra.gmra.mxu0 %vm421_vm3, %v2269_v55 }
0x1028   :  { %3798 = vmatpush3.msra.mxu0 %v4683_v27  ;;  %3813 = vmatprep.mubr.msk.f32.mxu0 %vm3978_vm1, %v3977_v0 }
0x1029   :  { %3799 = vmatprep.subr.mxu0 %v3977_v0 }
0x102a   :  { %3800 = vmatpush3.msra.mxu0 %v4692_v35 }
0x102b   :  { %3801 = vmatprep.subr.mxu0 %v3977_v0 }
0x102c   :  { %3802 = vmatpush3.msra.mxu0 %v4699_v36 }
0x102d   :  { %3803 = vmatprep.subr.mxu0 %v3977_v0 }
0x102e   :  { %3804 = vmatpush3.msra.mxu0 %v4706_v37 }
0x102f   :  { %3805 = vmatprep.subr.mxu0 %v3977_v0 }
0x1030   :  { %3806 = vmatpush3.msra.mxu0 %v4713_v38 }
0x1031   :  { %3807 = vmatprep.subr.mxu0 %v3977_v0 }
0x1032   :  { %3808 = vmatpush3.msra.mxu0 %v4720_v39 }
0x1033   :  { %3809 = vmatprep.subr.mxu0 %v3977_v0 }
0x1034   :  { %3810 = vmatpush3.msra.mxu0 %v4727_v40 }
0x1035   :  { %3811 = vmatprep.subr.mxu0 %v3977_v0 }
0x1036   :  { %3812 = vmatpush3.msra.mxu0 %v4734_v41 }
0x1037   :  { %3838 = vmatprep.subr.mxu0 %v3977_v0 }
0x10e7   :  { %v2339_v11 = vpop.f32.mrf.mxu0 }
0x10e8   :  { %v2340_v12 = vadd.f32 %v2339_v11, %v4237_v48 }
0x10e9   :  { %v3774_v13 = vpop.f32.mrf.mxu0 }
0x10ea   :  { %3951 = vtanh.f32 %v2340_v12 }
0x10eb   :  { %3953 = vtanh.f32 %v2263_v46 }
0x10f7   :  { %v3952_v61 = vpop.eup %3951 }
0x10f8   :  { %2494 = vrot.lane.b32.xlu0 %v3952_v61, %s3979_s0  ;;  %3784 = vmatmul.mubr.msk.f32.vlgmr.msra.gmra.mxu1 %vm269_vm2, %v3952_v61  ;;  %v3954_v3 = vpop.eup %3953 }
0x10f9   :  { %3787 = vmatpush3.msra.mxu1 %v4613_v21  ;;  %3794 = vmatprep.mubr.msk.f32.mxu1 %vm3978_vm1, %v3977_v0 }
0x10fa   :  { %3788 = vmatprep.subr.mxu1 %v3977_v0 }
0x10fb   :  { %3789 = vmatpush3.msra.mxu1 %v4622_v1 }
0x10fc   :  { %3790 = vmatprep.subr.mxu1 %v3977_v0 }
0x10fd   :  { %3791 = vmatpush3.msra.mxu1 %v4629_v22 }
0x10fe   :  { %3792 = vmatprep.subr.mxu1 %v3977_v0 }
0x10ff   :  { %3793 = vmatpush3.msra.mxu1 %v4638_v24 }
0x1100   :  { %3795 = vmatmul.mubr.msk.f32.vlgmr.msra.gmra.mxu1 %vm269_vm2, %v3954_v3  ;;  %3816 = vmatprep.subr.mxu1 %v3977_v0 }
0x1101   :  { %3817 = vmatpush3.msra.mxu1 %v4772_v56  ;;  %3824 = vmatprep.mubr.msk.f32.mxu1 %vm3978_vm1, %v3977_v0 }
0x1102   :  { %3818 = vmatprep.subr.mxu1 %v3977_v0 }
0x1103   :  { %3819 = vmatpush3.msra.mxu1 %v4777_v57 }
0x1104   :  { %3820 = vmatprep.subr.mxu1 %v3977_v0 }
0x1105   :  { %3821 = vmatpush3.msra.mxu1 %v4784_v58 }
0x1106   :  { %3822 = vmatprep.subr.mxu1 %v3977_v0 }
0x1107   :  { %3823 = vmatpush3.msra.mxu1 %v4791_v59 }
0x1108   :  { %3827 = vmatprep.subr.mxu1 %v3977_v0 }
0x116a   :  { %v2495_v2 = vpop.permute.xlu0 %2494 }
0x116b   :  { %v2497_v5 = vsel %vm269_vm2, %v3954_v3, %v2495_v2 }
0x116c   :  { %3814 = vmatmul.mubr.msk.f32.vlgmr.msra.gmra.mxu0 %vm421_vm3, %v2497_v5 }
0x116d   :  { %3839 = vmatpush3.msra.mxu0 %v4683_v27  ;;  %3854 = vmatprep.mubr.msk.f32.mxu0 %vm3978_vm1, %v3977_v0 }
0x116e   :  { %3840 = vmatprep.subr.mxu0 %v3977_v0 }
0x116f   :  { %3841 = vmatpush3.msra.mxu0 %v4692_v35 }
0x1170   :  { %3842 = vmatprep.subr.mxu0 %v3977_v0 }
0x1171   :  { %3843 = vmatpush3.msra.mxu0 %v4699_v36 }
0x1172   :  { %3844 = vmatprep.subr.mxu0 %v3977_v0 }
0x1173   :  { %3845 = vmatpush3.msra.mxu0 %v4706_v37 }
0x1174   :  { %3846 = vmatprep.subr.mxu0 %v3977_v0 }
0x1175   :  { %3847 = vmatpush3.msra.mxu0 %v4713_v38 }
0x1176   :  { %3848 = vmatprep.subr.mxu0 %v3977_v0 }
0x1177   :  { %3849 = vmatpush3.msra.mxu0 %v4720_v39 }
0x1178   :  { %3850 = vmatprep.subr.mxu0 %v3977_v0 }
0x1179   :  { %3851 = vmatpush3.msra.mxu0 %v4727_v40 }
0x117a   :  { %3852 = vmatprep.subr.mxu0 %v3977_v0 }
0x117b   :  { %3853 = vmatpush3.msra.mxu0 %v4734_v41 }
0x117c   :  { %3887 = vmatprep.subr.mxu0 %v3977_v0 }
0x11b8   :  { %v2413_v7 = vpop.f32.mrf.mxu1 }
0x11b9   :  { %v2414_v14 = vadd.f32 %v4844_v6, %v2413_v7 }
0x11ba   :  { %v3785_v15 = vpop.f32.mrf.mxu1 }
0x11bb   :  { %2418 = vst.msk [vmem:[%s4936_s7] sm:$0xff] %vm2417_vm4, %v2414_v14 }
0x11c0   :  { %v2488_v16 = vpop.f32.mrf.mxu1 }
0x11c1   :  { %v2492_v28 = vadd.f32 %v2488_v16, %v234_v26 }
0x11c2   :  { %v3796_v17 = vpop.f32.mrf.mxu1 }
0x122c   :  { %v2567_v18 = vpop.f32.mrf.mxu0 }
0x122d   :  { %v2568_v20 = vadd.f32 %v2567_v18, %v4237_v48 }
0x122e   :  { %v3815_v23 = vpop.f32.mrf.mxu0 }
0x122f   :  { %3955 = vtanh.f32 %v2568_v20 }
0x1230   :  { %3957 = vtanh.f32 %v2492_v28 }
0x123c   :  { %v3956_v29 = vpop.eup %3955 }
0x123d   :  { %2722 = vrot.lane.b32.xlu1 %v3956_v29, %s3979_s0  ;;  %3825 = vmatmul.mubr.msk.f32.vlgmr.msra.gmra.mxu1 %vm269_vm2, %v3956_v29  ;;  %v3958_v10 = vpop.eup %3957 }
0x123e   :  { %3828 = vmatpush3.msra.mxu1 %v4613_v21  ;;  %3835 = vmatprep.mubr.msk.f32.mxu1 %vm3978_vm1, %v3977_v0 }
0x123f   :  { %3829 = vmatprep.subr.mxu1 %v3977_v0 }
0x1240   :  { %3830 = vmatpush3.msra.mxu1 %v4622_v1 }
0x1241   :  { %3831 = vmatprep.subr.mxu1 %v3977_v0 }
0x1242   :  { %3832 = vmatpush3.msra.mxu1 %v4629_v22 }
0x1243   :  { %3833 = vmatprep.subr.mxu1 %v3977_v0 }
0x1244   :  { %3834 = vmatpush3.msra.mxu1 %v4638_v24 }
0x1245   :  { %3836 = vmatmul.mubr.msk.f32.vlgmr.msra.gmra.mxu1 %vm269_vm2, %v3958_v10  ;;  %3857 = vmatprep.subr.mxu1 %v3977_v0 }
0x1246   :  { %3858 = vmatpush3.msra.mxu1 %v4772_v56  ;;  %3865 = vmatprep.mubr.msk.f32.mxu1 %vm3978_vm1, %v3977_v0 }
0x1247   :  { %3859 = vmatprep.subr.mxu1 %v3977_v0 }
0x1248   :  { %3860 = vmatpush3.msra.mxu1 %v4777_v57 }
0x1249   :  { %3861 = vmatprep.subr.mxu1 %v3977_v0 }
0x124a   :  { %3862 = vmatpush3.msra.mxu1 %v4784_v58 }
0x124b   :  { %3863 = vmatprep.subr.mxu1 %v3977_v0 }
0x124c   :  { %3864 = vmatpush3.msra.mxu1 %v4791_v59 }
0x124d   :  { %3868 = vmatprep.subr.mxu1 %v3977_v0 }
0x12af   :  { %v2723_v21 = vpop.permute.xlu1 %2722 }
0x12b0   :  { %v2725_v1 = vsel %vm269_vm2, %v3958_v10, %v2723_v21 }
0x12b1   :  { %3855 = vmatmul.mubr.msk.f32.vlgmr.msra.gmra.mxu0 %vm421_vm3, %v2725_v1 }
0x12b2   :  { %3888 = vmatpush3.msra.mxu0 %v4772_v56  ;;  %3895 = vmatprep.mubr.msk.f32.mxu0 %vm3978_vm1, %v3977_v0 }
0x12b3   :  { %3889 = vmatprep.subr.mxu0 %v3977_v0 }
0x12b4   :  { %3890 = vmatpush3.msra.mxu0 %v4777_v57 }
0x12b5   :  { %3891 = vmatprep.subr.mxu0 %v3977_v0 }
0x12b6   :  { %3892 = vmatpush3.msra.mxu0 %v4784_v58 }
0x12b7   :  { %3893 = vmatprep.subr.mxu0 %v3977_v0 }
0x12b8   :  { %3894 = vmatpush3.msra.mxu0 %v4791_v59 }
0x12fd   :  { %v2641_v22 = vpop.f32.mrf.mxu1 }
0x12fe   :  { %v2642_v24 = vadd.f32 %v4844_v6, %v2641_v22 }
0x12ff   :  { %v3826_v30 = vpop.f32.mrf.mxu1 }
0x1300   :  { %3079 = vst.msk [vmem:[%s4936_s7 + $0x8] sm:$0xff] %vm2417_vm4, %v2642_v24 }
0x1305   :  { %v2716_v32 = vpop.f32.mrf.mxu1 }
0x1306   :  { %v2720_v60 = vadd.f32 %v2716_v32, %v239_v31 }
0x1307   :  { %v3837_v25 = vpop.f32.mrf.mxu1 }
0x1371   :  { %v2795_v33 = vpop.f32.mrf.mxu0 }
0x1372   :  { %v2796_v34 = vadd.f32 %v2795_v33, %v4237_v48 }
0x1373   :  { %v3856_v8 = vpop.f32.mrf.mxu0 }
0x1374   :  { %3959 = vtanh.f32 %v2796_v34 }
0x1375   :  { %3961 = vtanh.f32 %v2720_v60 }
0x1381   :  { %v3960_v42 = vpop.eup %3959 }
0x1382   :  { %2875 = vrot.lane.b32.xlu0 %v3960_v42, %s3979_s0  ;;  %3866 = vmatmul.mubr.msk.f32.vlgmr.msra.gmra.mxu1 %vm269_vm2, %v3960_v42  ;;  %v3962_v19 = vpop.eup %3961 }
0x1383   :  { %3869 = vmatpush3.msra.mxu1 %v4683_v27  ;;  %3884 = vmatprep.mubr.msk.f32.mxu1 %vm3978_vm1, %v3977_v0 }
0x1384   :  { %3870 = vmatprep.subr.mxu1 %v3977_v0 }
0x1385   :  { %3871 = vmatpush3.msra.mxu1 %v4692_v35 }
0x1386   :  { %3872 = vmatprep.subr.mxu1 %v3977_v0 }
0x1387   :  { %3873 = vmatpush3.msra.mxu1 %v4699_v36 }
0x1388   :  { %3874 = vmatprep.subr.mxu1 %v3977_v0 }
0x1389   :  { %3875 = vmatpush3.msra.mxu1 %v4706_v37 }
0x138a   :  { %3876 = vmatprep.subr.mxu1 %v3977_v0 }
0x138b   :  { %3877 = vmatpush3.msra.mxu1 %v4713_v38 }
0x138c   :  { %3878 = vmatprep.subr.mxu1 %v3977_v0 }
0x138d   :  { %3879 = vmatpush3.msra.mxu1 %v4720_v39 }
0x138e   :  { %3880 = vmatprep.subr.mxu1 %v3977_v0 }
0x138f   :  { %3881 = vmatpush3.msra.mxu1 %v4727_v40 }
0x1390   :  { %3882 = vmatprep.subr.mxu1 %v3977_v0 }
0x1391   :  { %3883 = vmatpush3.msra.mxu1 %v4734_v41 }
0x13f4   :  { %v2876_v9 = vpop.permute.xlu0 %2875 }
0x13f5   :  { %v2878_v27 = vsel %vm269_vm2, %v3962_v19, %v2876_v9 }
0x13f6   :  { %3885 = vmatmul.mubr.msk.f32.vlgmr.msra.gmra.mxu1 %vm421_vm3, %v2878_v27 }
0x1442   :  { %v2869_v35 = vpop.f32.mrf.mxu1 }
0x1443   :  { %v2870_v36 = vadd.f32 %v4844_v6, %v2869_v35 }
0x1444   :  { %v3867_v37 = vpop.f32.mrf.mxu1 }
0x1445   :  { %3083 = vst.msk [vmem:[%s4936_s7 + $0x10] sm:$0xff] %vm2417_vm4, %v2870_v36 }
0x14b6   :  { %v2948_v38 = vpop.f32.mrf.mxu1 }
0x14b7   :  { %v2949_v0 = vadd.f32 %v2948_v38, %v4237_v48 }
0x14b8   :  { %v3886_v39 = vpop.f32.mrf.mxu1 }
0x14b9   :  { %3963 = vtanh.f32 %v2949_v0 }
0x14c6   :  { %v3964_v40 = vpop.eup %3963 }
0x14c7   :  { %3896 = vmatmul.mubr.msk.f32.vlgmr.msra.gmra.mxu0 %vm269_vm2, %v3964_v40 }
0x1587   :  { %v3022_v41 = vpop.f32.mrf.mxu0 }
0x1588   :  { %v3023_v63 = vadd.f32 %v4844_v6, %v3022_v41 }
0x1589   :  { %v3897_v43 = vpop.f32.mrf.mxu0 }
0x158a   :  { %3086 = vst.msk [vmem:[%s4936_s7 + $0x18] sm:$0xff] %vm2417_vm4, %v3023_v63 }

</bundles_post_ra>
